<compile_context>
chip_gen: v6e
topology: v6e:2x2x1
jax: 0.10.0
libtpu: 0.0.40
codegen_flags: <defaults>
</compile_context>

<pallas_src>
import functools

import jax
import jax.numpy as jnp
from jax.experimental import pallas as pl
from jax.experimental.pallas import tpu as pltpu

INPUT_SIZE = 64
HIDDEN_SIZE = 64
NUM_CLASSES = 5
NUM_LAYERS = 1     # TODO(synk): only num_layers == 1 is implemented (matches the spec).
GATE_PAD = 128     # each gate's 64 outputs padded to a full 128-lane tile
BATCH_PAD = 8      # batch padded to a full 8-sublane tile


def lstm_kernel(x_ref, wih_ref, b_ref, whh_ref, wfc_ref, bfc_ref, out_ref,
                *, T, BP, G):
    """Whole-sequence LSTM forward in one kernel invocation.

    x_ref:   (T*BP, D)   f32, time-major, batch zero-padded to BP=8 sublanes
    wih_ref: (D, 4*G)    f32, fused input weights, gate k at cols [k*G, k*G+64),
                              sigmoid-gate columns pre-scaled by 0.5
    b_ref:   (1, 4*G)    f32, fused bias (b_ih + b_hh), same layout/scaling
    whh_ref: (G, 4*G)    bf16, fused recurrent weights (rows >= 64 are zero)
    wfc_ref: (G, C)      f32, classifier weight (transposed, rows >= 64 zero)
    bfc_ref: (1, C)      f32, classifier bias
    out_ref: (BP, C)     f32
    """
    x = x_ref[...]                                            # (T*BP, D)

    # Fused one-shot input projection + bias for ALL timesteps (off the serial
    # path): one MXU sequence + one broadcast add instead of 4 each.
    xw = jnp.dot(x, wih_ref[...],
                 preferred_element_type=jnp.float32) + b_ref[...]   # (T*BP, 4G)

    whh = whh_ref[...]                                        # (G, 4G) bf16, resident

    h = jnp.zeros((BP, G), jnp.float32)                       # h0 = 0 (padded lanes stay 0)
    c = jnp.zeros((BP, G), jnp.float32)                       # c0 = 0

    # Statically unrolled recurrence (T small & static): h/c live in vregs.
    # Per step: ONE fused (BP,G)@(G,4G) bf16 matmul (f32 acc) + one tanh over
    # the fused pre-activation + cheap VALU fmas.  All slices are tile-aligned
    # (8-sublane rows, 128-lane gate columns).
    for t in range(T):
        pre = xw[t * BP:(t + 1) * BP, :] + jnp.dot(
            h.astype(jnp.bfloat16), whh, preferred_element_type=jnp.float32)
        tg = jnp.tanh(pre)                                    # all 4 gates at once
        # sigmoid(z) = 0.5 * tanh(0.5 * z) + 0.5 ; the 0.5 pre-scale is already
        # folded into the i/f/o columns of wih/whh/b in prepare_params.
        i_g = 0.5 * tg[:, 0 * G:1 * G] + 0.5
        f_g = 0.5 * tg[:, 1 * G:2 * G] + 0.5
        g_g = tg[:, 2 * G:3 * G]
        o_g = 0.5 * tg[:, 3 * G:4 * G] + 0.5
        c = f_g * c + i_g * g_g
        h = o_g * jnp.tanh(c)

    # Final Linear on the LAST timestep's hidden state (f32).  Padded h lanes
    # are zero and wfc padded rows are zero, so no masking is needed.
    out_ref[...] = (jnp.dot(h, wfc_ref[...], preferred_element_type=jnp.float32)
                    + bfc_ref[...]).astype(out_ref.dtype)


def prepare_params(params):
    """One-time weight prep (hoisted out of the per-call forward pass).

    Builds lane-padded, gate-fused weight layouts and folds the 0.5 pre-scale
    for the sigmoid gates (i, f, o) into the weights and bias so the kernel can
    evaluate every gate nonlinearity with a single tanh.
    """
    H, D, C, G = HIDDEN_SIZE, INPUT_SIZE, NUM_CLASSES, GATE_PAD
    scale = (0.5, 0.5, 1.0, 0.5)                              # i, f, g, o

    w_ih_g = jnp.transpose(params["w_ih"].reshape(4, H, D), (0, 2, 1))  # (4, D, H)
    w_hh_g = jnp.transpose(params["w_hh"].reshape(4, H, H), (0, 2, 1))  # (4, Hin, Hout)
    b_g = (params["b_ih"] + params["b_hh"]).reshape(4, H)               # (4, H)

    w_ih_f = jnp.zeros((D, 4 * G), jnp.float32)
    w_hh_f = jnp.zeros((G, 4 * G), jnp.float32)
    b_f = jnp.zeros((1, 4 * G), jnp.float32)
    for k in range(4):
        w_ih_f = w_ih_f.at[:, k * G:k * G + H].set(w_ih_g[k] * scale[k])
        w_hh_f = w_hh_f.at[:H, k * G:k * G + H].set(w_hh_g[k] * scale[k])
        b_f = b_f.at[0, k * G:k * G + H].set(b_g[k] * scale[k])

    w_fc = jnp.zeros((G, C), jnp.float32).at[:H, :].set(params["w_fc"].T)
    b_fc = params["b_fc"].reshape(1, C).astype(jnp.float32)

    return {"w_ih": w_ih_f,                      # f32  (D, 4G)
            "w_hh": w_hh_f.astype(jnp.bfloat16),  # bf16 (G, 4G), f32 acc on MXU
            "b": b_f,                            # f32  (1, 4G)
            "w_fc": w_fc,                        # f32  (G, C)
            "b_fc": b_fc}                        # f32  (1, C)


@jax.jit
def lstm_model_forward(x, prepped):
    """x: (B, T, input_size) float32 (batch_first, matching the PyTorch module)."""
    B, T, D = x.shape
    BP = max(BATCH_PAD, ((B + 7) // 8) * 8)      # pad batch to 8-sublane tiles
    C = NUM_CLASSES

    # Zero-pad batch, then time-major flatten: row t*BP + b  <-  x[b, t, :].
    # Padded rows run a harmless zero-input LSTM and are sliced off below.
    x_p = jnp.zeros((BP, T, D), jnp.float32).at[:B].set(x)
    x_tm = jnp.transpose(x_p, (1, 0, 2)).reshape(T * BP, D)

    vmem = pl.BlockSpec(memory_space=pltpu.MemorySpace.VMEM)
    kernel = functools.partial(lstm_kernel, T=T, BP=BP, G=GATE_PAD)
    out_p = pl.pallas_call(
        kernel,
        out_shape=jax.ShapeDtypeStruct((BP, C), jnp.float32),
        in_specs=[vmem, vmem, vmem, vmem, vmem, vmem],
        out_specs=vmem,
    )(x_tm, prepped["w_ih"], prepped["b"], prepped["w_hh"],
      prepped["w_fc"], prepped["b_fc"])
    return out_p[:B]


def init_params(key):
    """Deterministic init matching PyTorch nn.LSTM / nn.Linear shapes."""
    H, D, C = HIDDEN_SIZE, INPUT_SIZE, NUM_CLASSES
    ks = jax.random.split(key, 6)
    s = 1.0 / jnp.sqrt(H)
    return {
        "w_ih": jax.random.uniform(ks[0], (4 * H, D), jnp.float32, -s, s),
        "w_hh": jax.random.uniform(ks[1], (4 * H, H), jnp.float32, -s, s),
        "b_ih": jax.random.uniform(ks[2], (4 * H,), jnp.float32, -s, s),
        "b_hh": jax.random.uniform(ks[3], (4 * H,), jnp.float32, -s, s),
        "w_fc": jax.random.uniform(ks[4], (C, H), jnp.float32, -s, s),
        "b_fc": jax.random.uniform(ks[5], (C,), jnp.float32, -s, s),
    }


def reference_forward(x, params):
    """Pure-JAX f32 reference of the same forward pass (PyTorch semantics)."""
    B, T, D = x.shape
    H = HIDDEN_SIZE
    h = jnp.zeros((B, H), jnp.float32)
    c = jnp.zeros((B, H), jnp.float32)
    b = params["b_ih"] + params["b_hh"]
    for t in range(T):
        gates = x[:, t, :] @ params["w_ih"].T + h @ params["w_hh"].T + b
        i_g = jax.nn.sigmoid(gates[:, 0 * H:1 * H])
        f_g = jax.nn.sigmoid(gates[:, 1 * H:2 * H])
        g_g = jnp.tanh(gates[:, 2 * H:3 * H])
        o_g = jax.nn.sigmoid(gates[:, 3 * H:4 * H])
        c = f_g * c + i_g * g_g
        h = o_g * jnp.tanh(c)
    return h @ params["w_fc"].T + params["b_fc"]


if __name__ == "__main__":
    key = jax.random.PRNGKey(0)
    k_p, k_x = jax.random.split(key)

    B, T = 2, 8
    params = init_params(k_p)
    prepped = prepare_params(params)          # one-time weight prep (hoisted)
    x = jax.random.normal(k_x, (B, T, INPUT_SIZE), jnp.float32)

    out = jax.block_until_ready(lstm_model_forward(x, prepped))

    ref = reference_forward(x, params)
    assert out.shape == (B, NUM_CLASSES)
    # Recurrent matmuls use bf16 weights / bf16 h operand with f32 accumulation
    # -> slightly looser tolerance than a pure-f32 comparison.
    assert jnp.allclose(out, ref, atol=1e-2, rtol=1e-2), "mismatch vs reference"

    print("KERNEL_OK")
</pallas_src>

<mosaic_0001>
module attributes {stable_mosaic.version = 11 : i64} {
  func.func @lstm_kernel(%arg0: memref<64x64xf32, #tpu.memory_space<vmem>>, %arg1: memref<64x512xf32, #tpu.memory_space<vmem>>, %arg2: memref<1x512xf32, #tpu.memory_space<vmem>>, %arg3: memref<128x512xbf16, #tpu.memory_space<vmem>>, %arg4: memref<128x5xf32, #tpu.memory_space<vmem>>, %arg5: memref<1x5xf32, #tpu.memory_space<vmem>>, %arg6: memref<8x5xf32, #tpu.memory_space<vmem>>) attributes {dimension_semantics = [], scalar_prefetch = 0 : i64, scratch_operands = 0 : i64, tpu.core_type = #tpu.core_type<tc>} {
    %c0 = arith.constant 0 : index
    %c0_0 = arith.constant 0 : index
    %0 = vector.load %arg0[%c0, %c0_0] : memref<64x64xf32, #tpu.memory_space<vmem>>, vector<64x64xf32>
    %c0_1 = arith.constant 0 : index
    %c0_2 = arith.constant 0 : index
    %1 = vector.load %arg1[%c0_1, %c0_2] : memref<64x512xf32, #tpu.memory_space<vmem>>, vector<64x512xf32>
    %cst = arith.constant dense<0.000000e+00> : vector<64x512xf32>
    %2 = tpu.matmul %0, %1, %cst {dimension_numbers = #tpu.dot_dimension_numbers<[1], [0], [0], [1], [0, 0, 1, 1], [], []>} : vector<64x64xf32>, vector<64x512xf32>, vector<64x512xf32> -> vector<64x512xf32>
    %c0_3 = arith.constant 0 : index
    %c0_4 = arith.constant 0 : index
    %3 = vector.load %arg2[%c0_3, %c0_4] : memref<1x512xf32, #tpu.memory_space<vmem>>, vector<1x512xf32>
    %4 = vector.broadcast %3 : vector<1x512xf32> to vector<64x512xf32>
    %5 = arith.addf %2, %4 : vector<64x512xf32>
    %c0_5 = arith.constant 0 : index
    %c0_6 = arith.constant 0 : index
    %6 = vector.load %arg3[%c0_5, %c0_6] : memref<128x512xbf16, #tpu.memory_space<vmem>>, vector<128x512xbf16>
    %cst_7 = arith.constant 0.000000e+00 : f32
    %7 = vector.broadcast %cst_7 : f32 to vector<8x128xf32>
    %cst_8 = arith.constant 0.000000e+00 : f32
    %8 = vector.broadcast %cst_8 : f32 to vector<8x128xf32>
    %9 = vector.extract_strided_slice %5 {offsets = [0, 0], sizes = [8, 512], strides = [1, 1]} : vector<64x512xf32> to vector<8x512xf32>
    %10 = arith.truncf %7 : vector<8x128xf32> to vector<8x128xbf16>
    %cst_9 = arith.constant dense<0.000000e+00> : vector<8x512xf32>
    %11 = tpu.matmul %10, %6, %cst_9 {dimension_numbers = #tpu.dot_dimension_numbers<[1], [0], [0], [1], [0, 0, 1, 1], [], []>} : vector<8x128xbf16>, vector<128x512xbf16>, vector<8x512xf32> -> vector<8x512xf32>
    %12 = arith.addf %9, %11 : vector<8x512xf32>
    %13 = math.tanh %12 : vector<8x512xf32>
    %14 = vector.extract_strided_slice %13 {offsets = [0, 0], sizes = [8, 128], strides = [1, 1]} : vector<8x512xf32> to vector<8x128xf32>
    %cst_10 = arith.constant 5.000000e-01 : f32
    %15 = vector.broadcast %cst_10 : f32 to vector<8x128xf32>
    %16 = arith.mulf %15, %14 : vector<8x128xf32>
    %cst_11 = arith.constant 5.000000e-01 : f32
    %17 = vector.broadcast %cst_11 : f32 to vector<8x128xf32>
    %18 = arith.addf %16, %17 : vector<8x128xf32>
    %19 = vector.extract_strided_slice %13 {offsets = [0, 128], sizes = [8, 128], strides = [1, 1]} : vector<8x512xf32> to vector<8x128xf32>
    %cst_12 = arith.constant 5.000000e-01 : f32
    %20 = vector.broadcast %cst_12 : f32 to vector<8x128xf32>
    %21 = arith.mulf %20, %19 : vector<8x128xf32>
    %cst_13 = arith.constant 5.000000e-01 : f32
    %22 = vector.broadcast %cst_13 : f32 to vector<8x128xf32>
    %23 = arith.addf %21, %22 : vector<8x128xf32>
    %24 = vector.extract_strided_slice %13 {offsets = [0, 256], sizes = [8, 128], strides = [1, 1]} : vector<8x512xf32> to vector<8x128xf32>
    %25 = vector.extract_strided_slice %13 {offsets = [0, 384], sizes = [8, 128], strides = [1, 1]} : vector<8x512xf32> to vector<8x128xf32>
    %cst_14 = arith.constant 5.000000e-01 : f32
    %26 = vector.broadcast %cst_14 : f32 to vector<8x128xf32>
    %27 = arith.mulf %26, %25 : vector<8x128xf32>
    %cst_15 = arith.constant 5.000000e-01 : f32
    %28 = vector.broadcast %cst_15 : f32 to vector<8x128xf32>
    %29 = arith.addf %27, %28 : vector<8x128xf32>
    %30 = arith.mulf %23, %8 : vector<8x128xf32>
    %31 = arith.mulf %18, %24 : vector<8x128xf32>
    %32 = arith.addf %30, %31 : vector<8x128xf32>
    %33 = math.tanh %32 : vector<8x128xf32>
    %34 = arith.mulf %29, %33 : vector<8x128xf32>
    %35 = vector.extract_strided_slice %5 {offsets = [8, 0], sizes = [8, 512], strides = [1, 1]} : vector<64x512xf32> to vector<8x512xf32>
    %36 = arith.truncf %34 : vector<8x128xf32> to vector<8x128xbf16>
    %cst_16 = arith.constant dense<0.000000e+00> : vector<8x512xf32>
    %37 = tpu.matmul %36, %6, %cst_16 {dimension_numbers = #tpu.dot_dimension_numbers<[1], [0], [0], [1], [0, 0, 1, 1], [], []>} : vector<8x128xbf16>, vector<128x512xbf16>, vector<8x512xf32> -> vector<8x512xf32>
    %38 = arith.addf %35, %37 : vector<8x512xf32>
    %39 = math.tanh %38 : vector<8x512xf32>
    %40 = vector.extract_strided_slice %39 {offsets = [0, 0], sizes = [8, 128], strides = [1, 1]} : vector<8x512xf32> to vector<8x128xf32>
    %cst_17 = arith.constant 5.000000e-01 : f32
    %41 = vector.broadcast %cst_17 : f32 to vector<8x128xf32>
    %42 = arith.mulf %41, %40 : vector<8x128xf32>
    %cst_18 = arith.constant 5.000000e-01 : f32
    %43 = vector.broadcast %cst_18 : f32 to vector<8x128xf32>
    %44 = arith.addf %42, %43 : vector<8x128xf32>
    %45 = vector.extract_strided_slice %39 {offsets = [0, 128], sizes = [8, 128], strides = [1, 1]} : vector<8x512xf32> to vector<8x128xf32>
    %cst_19 = arith.constant 5.000000e-01 : f32
    %46 = vector.broadcast %cst_19 : f32 to vector<8x128xf32>
    %47 = arith.mulf %46, %45 : vector<8x128xf32>
    %cst_20 = arith.constant 5.000000e-01 : f32
    %48 = vector.broadcast %cst_20 : f32 to vector<8x128xf32>
    %49 = arith.addf %47, %48 : vector<8x128xf32>
    %50 = vector.extract_strided_slice %39 {offsets = [0, 256], sizes = [8, 128], strides = [1, 1]} : vector<8x512xf32> to vector<8x128xf32>
    %51 = vector.extract_strided_slice %39 {offsets = [0, 384], sizes = [8, 128], strides = [1, 1]} : vector<8x512xf32> to vector<8x128xf32>
    %cst_21 = arith.constant 5.000000e-01 : f32
    %52 = vector.broadcast %cst_21 : f32 to vector<8x128xf32>
    %53 = arith.mulf %52, %51 : vector<8x128xf32>
    %cst_22 = arith.constant 5.000000e-01 : f32
    %54 = vector.broadcast %cst_22 : f32 to vector<8x128xf32>
    %55 = arith.addf %53, %54 : vector<8x128xf32>
    %56 = arith.mulf %49, %32 : vector<8x128xf32>
    %57 = arith.mulf %44, %50 : vector<8x128xf32>
    %58 = arith.addf %56, %57 : vector<8x128xf32>
    %59 = math.tanh %58 : vector<8x128xf32>
    %60 = arith.mulf %55, %59 : vector<8x128xf32>
    %61 = vector.extract_strided_slice %5 {offsets = [16, 0], sizes = [8, 512], strides = [1, 1]} : vector<64x512xf32> to vector<8x512xf32>
    %62 = arith.truncf %60 : vector<8x128xf32> to vector<8x128xbf16>
    %cst_23 = arith.constant dense<0.000000e+00> : vector<8x512xf32>
    %63 = tpu.matmul %62, %6, %cst_23 {dimension_numbers = #tpu.dot_dimension_numbers<[1], [0], [0], [1], [0, 0, 1, 1], [], []>} : vector<8x128xbf16>, vector<128x512xbf16>, vector<8x512xf32> -> vector<8x512xf32>
    %64 = arith.addf %61, %63 : vector<8x512xf32>
    %65 = math.tanh %64 : vector<8x512xf32>
    %66 = vector.extract_strided_slice %65 {offsets = [0, 0], sizes = [8, 128], strides = [1, 1]} : vector<8x512xf32> to vector<8x128xf32>
    %cst_24 = arith.constant 5.000000e-01 : f32
    %67 = vector.broadcast %cst_24 : f32 to vector<8x128xf32>
    %68 = arith.mulf %67, %66 : vector<8x128xf32>
    %cst_25 = arith.constant 5.000000e-01 : f32
    %69 = vector.broadcast %cst_25 : f32 to vector<8x128xf32>
    %70 = arith.addf %68, %69 : vector<8x128xf32>
    %71 = vector.extract_strided_slice %65 {offsets = [0, 128], sizes = [8, 128], strides = [1, 1]} : vector<8x512xf32> to vector<8x128xf32>
    %cst_26 = arith.constant 5.000000e-01 : f32
    %72 = vector.broadcast %cst_26 : f32 to vector<8x128xf32>
    %73 = arith.mulf %72, %71 : vector<8x128xf32>
    %cst_27 = arith.constant 5.000000e-01 : f32
    %74 = vector.broadcast %cst_27 : f32 to vector<8x128xf32>
    %75 = arith.addf %73, %74 : vector<8x128xf32>
    %76 = vector.extract_strided_slice %65 {offsets = [0, 256], sizes = [8, 128], strides = [1, 1]} : vector<8x512xf32> to vector<8x128xf32>
    %77 = vector.extract_strided_slice %65 {offsets = [0, 384], sizes = [8, 128], strides = [1, 1]} : vector<8x512xf32> to vector<8x128xf32>
    %cst_28 = arith.constant 5.000000e-01 : f32
    %78 = vector.broadcast %cst_28 : f32 to vector<8x128xf32>
    %79 = arith.mulf %78, %77 : vector<8x128xf32>
    %cst_29 = arith.constant 5.000000e-01 : f32
    %80 = vector.broadcast %cst_29 : f32 to vector<8x128xf32>
    %81 = arith.addf %79, %80 : vector<8x128xf32>
    %82 = arith.mulf %75, %58 : vector<8x128xf32>
    %83 = arith.mulf %70, %76 : vector<8x128xf32>
    %84 = arith.addf %82, %83 : vector<8x128xf32>
    %85 = math.tanh %84 : vector<8x128xf32>
    %86 = arith.mulf %81, %85 : vector<8x128xf32>
    %87 = vector.extract_strided_slice %5 {offsets = [24, 0], sizes = [8, 512], strides = [1, 1]} : vector<64x512xf32> to vector<8x512xf32>
    %88 = arith.truncf %86 : vector<8x128xf32> to vector<8x128xbf16>
    %cst_30 = arith.constant dense<0.000000e+00> : vector<8x512xf32>
    %89 = tpu.matmul %88, %6, %cst_30 {dimension_numbers = #tpu.dot_dimension_numbers<[1], [0], [0], [1], [0, 0, 1, 1], [], []>} : vector<8x128xbf16>, vector<128x512xbf16>, vector<8x512xf32> -> vector<8x512xf32>
    %90 = arith.addf %87, %89 : vector<8x512xf32>
    %91 = math.tanh %90 : vector<8x512xf32>
    %92 = vector.extract_strided_slice %91 {offsets = [0, 0], sizes = [8, 128], strides = [1, 1]} : vector<8x512xf32> to vector<8x128xf32>
    %cst_31 = arith.constant 5.000000e-01 : f32
    %93 = vector.broadcast %cst_31 : f32 to vector<8x128xf32>
    %94 = arith.mulf %93, %92 : vector<8x128xf32>
    %cst_32 = arith.constant 5.000000e-01 : f32
    %95 = vector.broadcast %cst_32 : f32 to vector<8x128xf32>
    %96 = arith.addf %94, %95 : vector<8x128xf32>
    %97 = vector.extract_strided_slice %91 {offsets = [0, 128], sizes = [8, 128], strides = [1, 1]} : vector<8x512xf32> to vector<8x128xf32>
    %cst_33 = arith.constant 5.000000e-01 : f32
    %98 = vector.broadcast %cst_33 : f32 to vector<8x128xf32>
    %99 = arith.mulf %98, %97 : vector<8x128xf32>
    %cst_34 = arith.constant 5.000000e-01 : f32
    %100 = vector.broadcast %cst_34 : f32 to vector<8x128xf32>
    %101 = arith.addf %99, %100 : vector<8x128xf32>
    %102 = vector.extract_strided_slice %91 {offsets = [0, 256], sizes = [8, 128], strides = [1, 1]} : vector<8x512xf32> to vector<8x128xf32>
    %103 = vector.extract_strided_slice %91 {offsets = [0, 384], sizes = [8, 128], strides = [1, 1]} : vector<8x512xf32> to vector<8x128xf32>
    %cst_35 = arith.constant 5.000000e-01 : f32
    %104 = vector.broadcast %cst_35 : f32 to vector<8x128xf32>
    %105 = arith.mulf %104, %103 : vector<8x128xf32>
    %cst_36 = arith.constant 5.000000e-01 : f32
    %106 = vector.broadcast %cst_36 : f32 to vector<8x128xf32>
    %107 = arith.addf %105, %106 : vector<8x128xf32>
    %108 = arith.mulf %101, %84 : vector<8x128xf32>
    %109 = arith.mulf %96, %102 : vector<8x128xf32>
    %110 = arith.addf %108, %109 : vector<8x128xf32>
    %111 = math.tanh %110 : vector<8x128xf32>
    %112 = arith.mulf %107, %111 : vector<8x128xf32>
    %113 = vector.extract_strided_slice %5 {offsets = [32, 0], sizes = [8, 512], strides = [1, 1]} : vector<64x512xf32> to vector<8x512xf32>
    %114 = arith.truncf %112 : vector<8x128xf32> to vector<8x128xbf16>
    %cst_37 = arith.constant dense<0.000000e+00> : vector<8x512xf32>
    %115 = tpu.matmul %114, %6, %cst_37 {dimension_numbers = #tpu.dot_dimension_numbers<[1], [0], [0], [1], [0, 0, 1, 1], [], []>} : vector<8x128xbf16>, vector<128x512xbf16>, vector<8x512xf32> -> vector<8x512xf32>
    %116 = arith.addf %113, %115 : vector<8x512xf32>
    %117 = math.tanh %116 : vector<8x512xf32>
    %118 = vector.extract_strided_slice %117 {offsets = [0, 0], sizes = [8, 128], strides = [1, 1]} : vector<8x512xf32> to vector<8x128xf32>
    %cst_38 = arith.constant 5.000000e-01 : f32
    %119 = vector.broadcast %cst_38 : f32 to vector<8x128xf32>
    %120 = arith.mulf %119, %118 : vector<8x128xf32>
    %cst_39 = arith.constant 5.000000e-01 : f32
    %121 = vector.broadcast %cst_39 : f32 to vector<8x128xf32>
    %122 = arith.addf %120, %121 : vector<8x128xf32>
    %123 = vector.extract_strided_slice %117 {offsets = [0, 128], sizes = [8, 128], strides = [1, 1]} : vector<8x512xf32> to vector<8x128xf32>
    %cst_40 = arith.constant 5.000000e-01 : f32
    %124 = vector.broadcast %cst_40 : f32 to vector<8x128xf32>
    %125 = arith.mulf %124, %123 : vector<8x128xf32>
    %cst_41 = arith.constant 5.000000e-01 : f32
    %126 = vector.broadcast %cst_41 : f32 to vector<8x128xf32>
    %127 = arith.addf %125, %126 : vector<8x128xf32>
    %128 = vector.extract_strided_slice %117 {offsets = [0, 256], sizes = [8, 128], strides = [1, 1]} : vector<8x512xf32> to vector<8x128xf32>
    %129 = vector.extract_strided_slice %117 {offsets = [0, 384], sizes = [8, 128], strides = [1, 1]} : vector<8x512xf32> to vector<8x128xf32>
    %cst_42 = arith.constant 5.000000e-01 : f32
    %130 = vector.broadcast %cst_42 : f32 to vector<8x128xf32>
    %131 = arith.mulf %130, %129 : vector<8x128xf32>
    %cst_43 = arith.constant 5.000000e-01 : f32
    %132 = vector.broadcast %cst_43 : f32 to vector<8x128xf32>
    %133 = arith.addf %131, %132 : vector<8x128xf32>
    %134 = arith.mulf %127, %110 : vector<8x128xf32>
    %135 = arith.mulf %122, %128 : vector<8x128xf32>
    %136 = arith.addf %134, %135 : vector<8x128xf32>
    %137 = math.tanh %136 : vector<8x128xf32>
    %138 = arith.mulf %133, %137 : vector<8x128xf32>
    %139 = vector.extract_strided_slice %5 {offsets = [40, 0], sizes = [8, 512], strides = [1, 1]} : vector<64x512xf32> to vector<8x512xf32>
    %140 = arith.truncf %138 : vector<8x128xf32> to vector<8x128xbf16>
    %cst_44 = arith.constant dense<0.000000e+00> : vector<8x512xf32>
    %141 = tpu.matmul %140, %6, %cst_44 {dimension_numbers = #tpu.dot_dimension_numbers<[1], [0], [0], [1], [0, 0, 1, 1], [], []>} : vector<8x128xbf16>, vector<128x512xbf16>, vector<8x512xf32> -> vector<8x512xf32>
    %142 = arith.addf %139, %141 : vector<8x512xf32>
    %143 = math.tanh %142 : vector<8x512xf32>
    %144 = vector.extract_strided_slice %143 {offsets = [0, 0], sizes = [8, 128], strides = [1, 1]} : vector<8x512xf32> to vector<8x128xf32>
    %cst_45 = arith.constant 5.000000e-01 : f32
    %145 = vector.broadcast %cst_45 : f32 to vector<8x128xf32>
    %146 = arith.mulf %145, %144 : vector<8x128xf32>
    %cst_46 = arith.constant 5.000000e-01 : f32
    %147 = vector.broadcast %cst_46 : f32 to vector<8x128xf32>
    %148 = arith.addf %146, %147 : vector<8x128xf32>
    %149 = vector.extract_strided_slice %143 {offsets = [0, 128], sizes = [8, 128], strides = [1, 1]} : vector<8x512xf32> to vector<8x128xf32>
    %cst_47 = arith.constant 5.000000e-01 : f32
    %150 = vector.broadcast %cst_47 : f32 to vector<8x128xf32>
    %151 = arith.mulf %150, %149 : vector<8x128xf32>
    %cst_48 = arith.constant 5.000000e-01 : f32
    %152 = vector.broadcast %cst_48 : f32 to vector<8x128xf32>
    %153 = arith.addf %151, %152 : vector<8x128xf32>
    %154 = vector.extract_strided_slice %143 {offsets = [0, 256], sizes = [8, 128], strides = [1, 1]} : vector<8x512xf32> to vector<8x128xf32>
    %155 = vector.extract_strided_slice %143 {offsets = [0, 384], sizes = [8, 128], strides = [1, 1]} : vector<8x512xf32> to vector<8x128xf32>
    %cst_49 = arith.constant 5.000000e-01 : f32
    %156 = vector.broadcast %cst_49 : f32 to vector<8x128xf32>
    %157 = arith.mulf %156, %155 : vector<8x128xf32>
    %cst_50 = arith.constant 5.000000e-01 : f32
    %158 = vector.broadcast %cst_50 : f32 to vector<8x128xf32>
    %159 = arith.addf %157, %158 : vector<8x128xf32>
    %160 = arith.mulf %153, %136 : vector<8x128xf32>
    %161 = arith.mulf %148, %154 : vector<8x128xf32>
    %162 = arith.addf %160, %161 : vector<8x128xf32>
    %163 = math.tanh %162 : vector<8x128xf32>
    %164 = arith.mulf %159, %163 : vector<8x128xf32>
    %165 = vector.extract_strided_slice %5 {offsets = [48, 0], sizes = [8, 512], strides = [1, 1]} : vector<64x512xf32> to vector<8x512xf32>
    %166 = arith.truncf %164 : vector<8x128xf32> to vector<8x128xbf16>
    %cst_51 = arith.constant dense<0.000000e+00> : vector<8x512xf32>
    %167 = tpu.matmul %166, %6, %cst_51 {dimension_numbers = #tpu.dot_dimension_numbers<[1], [0], [0], [1], [0, 0, 1, 1], [], []>} : vector<8x128xbf16>, vector<128x512xbf16>, vector<8x512xf32> -> vector<8x512xf32>
    %168 = arith.addf %165, %167 : vector<8x512xf32>
    %169 = math.tanh %168 : vector<8x512xf32>
    %170 = vector.extract_strided_slice %169 {offsets = [0, 0], sizes = [8, 128], strides = [1, 1]} : vector<8x512xf32> to vector<8x128xf32>
    %cst_52 = arith.constant 5.000000e-01 : f32
    %171 = vector.broadcast %cst_52 : f32 to vector<8x128xf32>
    %172 = arith.mulf %171, %170 : vector<8x128xf32>
    %cst_53 = arith.constant 5.000000e-01 : f32
    %173 = vector.broadcast %cst_53 : f32 to vector<8x128xf32>
    %174 = arith.addf %172, %173 : vector<8x128xf32>
    %175 = vector.extract_strided_slice %169 {offsets = [0, 128], sizes = [8, 128], strides = [1, 1]} : vector<8x512xf32> to vector<8x128xf32>
    %cst_54 = arith.constant 5.000000e-01 : f32
    %176 = vector.broadcast %cst_54 : f32 to vector<8x128xf32>
    %177 = arith.mulf %176, %175 : vector<8x128xf32>
    %cst_55 = arith.constant 5.000000e-01 : f32
    %178 = vector.broadcast %cst_55 : f32 to vector<8x128xf32>
    %179 = arith.addf %177, %178 : vector<8x128xf32>
    %180 = vector.extract_strided_slice %169 {offsets = [0, 256], sizes = [8, 128], strides = [1, 1]} : vector<8x512xf32> to vector<8x128xf32>
    %181 = vector.extract_strided_slice %169 {offsets = [0, 384], sizes = [8, 128], strides = [1, 1]} : vector<8x512xf32> to vector<8x128xf32>
    %cst_56 = arith.constant 5.000000e-01 : f32
    %182 = vector.broadcast %cst_56 : f32 to vector<8x128xf32>
    %183 = arith.mulf %182, %181 : vector<8x128xf32>
    %cst_57 = arith.constant 5.000000e-01 : f32
    %184 = vector.broadcast %cst_57 : f32 to vector<8x128xf32>
    %185 = arith.addf %183, %184 : vector<8x128xf32>
    %186 = arith.mulf %179, %162 : vector<8x128xf32>
    %187 = arith.mulf %174, %180 : vector<8x128xf32>
    %188 = arith.addf %186, %187 : vector<8x128xf32>
    %189 = math.tanh %188 : vector<8x128xf32>
    %190 = arith.mulf %185, %189 : vector<8x128xf32>
    %191 = vector.extract_strided_slice %5 {offsets = [56, 0], sizes = [8, 512], strides = [1, 1]} : vector<64x512xf32> to vector<8x512xf32>
    %192 = arith.truncf %190 : vector<8x128xf32> to vector<8x128xbf16>
    %cst_58 = arith.constant dense<0.000000e+00> : vector<8x512xf32>
    %193 = tpu.matmul %192, %6, %cst_58 {dimension_numbers = #tpu.dot_dimension_numbers<[1], [0], [0], [1], [0, 0, 1, 1], [], []>} : vector<8x128xbf16>, vector<128x512xbf16>, vector<8x512xf32> -> vector<8x512xf32>
    %194 = arith.addf %191, %193 : vector<8x512xf32>
    %195 = math.tanh %194 : vector<8x512xf32>
    %196 = vector.extract_strided_slice %195 {offsets = [0, 0], sizes = [8, 128], strides = [1, 1]} : vector<8x512xf32> to vector<8x128xf32>
    %cst_59 = arith.constant 5.000000e-01 : f32
    %197 = vector.broadcast %cst_59 : f32 to vector<8x128xf32>
    %198 = arith.mulf %197, %196 : vector<8x128xf32>
    %cst_60 = arith.constant 5.000000e-01 : f32
    %199 = vector.broadcast %cst_60 : f32 to vector<8x128xf32>
    %200 = arith.addf %198, %199 : vector<8x128xf32>
    %201 = vector.extract_strided_slice %195 {offsets = [0, 128], sizes = [8, 128], strides = [1, 1]} : vector<8x512xf32> to vector<8x128xf32>
    %cst_61 = arith.constant 5.000000e-01 : f32
    %202 = vector.broadcast %cst_61 : f32 to vector<8x128xf32>
    %203 = arith.mulf %202, %201 : vector<8x128xf32>
    %cst_62 = arith.constant 5.000000e-01 : f32
    %204 = vector.broadcast %cst_62 : f32 to vector<8x128xf32>
    %205 = arith.addf %203, %204 : vector<8x128xf32>
    %206 = vector.extract_strided_slice %195 {offsets = [0, 256], sizes = [8, 128], strides = [1, 1]} : vector<8x512xf32> to vector<8x128xf32>
    %207 = vector.extract_strided_slice %195 {offsets = [0, 384], sizes = [8, 128], strides = [1, 1]} : vector<8x512xf32> to vector<8x128xf32>
    %cst_63 = arith.constant 5.000000e-01 : f32
    %208 = vector.broadcast %cst_63 : f32 to vector<8x128xf32>
    %209 = arith.mulf %208, %207 : vector<8x128xf32>
    %cst_64 = arith.constant 5.000000e-01 : f32
    %210 = vector.broadcast %cst_64 : f32 to vector<8x128xf32>
    %211 = arith.addf %209, %210 : vector<8x128xf32>
    %212 = arith.mulf %205, %188 : vector<8x128xf32>
    %213 = arith.mulf %200, %206 : vector<8x128xf32>
    %214 = arith.addf %212, %213 : vector<8x128xf32>
    %215 = math.tanh %214 : vector<8x128xf32>
    %216 = arith.mulf %211, %215 : vector<8x128xf32>
    %c0_65 = arith.constant 0 : index
    %c0_66 = arith.constant 0 : index
    %217 = vector.load %arg4[%c0_65, %c0_66] : memref<128x5xf32, #tpu.memory_space<vmem>>, vector<128x5xf32>
    %cst_67 = arith.constant dense<0.000000e+00> : vector<8x5xf32>
    %218 = tpu.matmul %216, %217, %cst_67 {dimension_numbers = #tpu.dot_dimension_numbers<[1], [0], [0], [1], [0, 0, 1, 1], [], []>} : vector<8x128xf32>, vector<128x5xf32>, vector<8x5xf32> -> vector<8x5xf32>
    %c0_68 = arith.constant 0 : index
    %c0_69 = arith.constant 0 : index
    %219 = vector.load %arg5[%c0_68, %c0_69] : memref<1x5xf32, #tpu.memory_space<vmem>>, vector<1x5xf32>
    %220 = vector.broadcast %219 : vector<1x5xf32> to vector<8x5xf32>
    %221 = arith.addf %218, %220 : vector<8x5xf32>
    %c0_70 = arith.constant 0 : index
    %c0_71 = arith.constant 0 : index
    %222 = vector.load %arg6[%c0_70, %c0_71] : memref<8x5xf32, #tpu.memory_space<vmem>>, vector<8x5xf32>
    tpu.vector_store %arg6[%c0_70, %c0_71], %221 {strides = array<i32>} : memref<8x5xf32, #tpu.memory_space<vmem>>, vector<8x5xf32>,
    return
  }
}

</mosaic_0001>

<bundles_post_ra>
// kernel: lstm_model_forward.1
= control target key start
LH: loop header
LB: loop body
LE: loop exit
PB: predicated region body
PF: predicated region fallthrough
CT: control target
= control target key end

     0   :  { %11 = vsyncpa [#allocation3], 0  ;;  %s1747_s21 = smov [#allocation2]   ;;  %s2515_s0 = inlined_call_operand.vmem [shape: f32[64,64], index: 0, kind: input, shape index: {}]   ;;  %s2516_s1 = inlined_call_operand.vmem [shape: f32[64,512], index: 1, kind: input, shape index: {}]   ;;  %s2517_s2 = inlined_call_operand.vmem [shape: f32[1,512], index: 2, kind: input, shape index: {}]   ;;  %s2518_s3 = inlined_call_operand.hbm [shape: bf16[128,512], index: 3, kind: input, shape index: {}]   ;;  %s2519_s4 = inlined_call_operand.vmem [shape: f32[128,5], index: 4, kind: input, shape index: {}]   ;;  %s2520_s5 = inlined_call_operand.vmem [shape: f32[1,5], index: 5, kind: input, shape index: {}]   ;;  %s2521_s6 = inlined_call_operand.vmem [shape: f32[8,5], index: 6, kind: output, shape index: {}]  }
   0x1   :  { %s23_s22 = sshll.u32 %s1747_s21, 4  ;;  %s24_s22 = int_to_ptr.vmem [resolvable:$true] %s23_s22 }
   0x2   :  { %s1733_s23 = scalar_lea.vmem %s24_s22, 4096  ;;  %p1738_p1 = scmp.lt.s32.totalorder %s24_s22, %s24_s22 }
   0x3   :  { %p1734_p0 = scmp.ne.s32.totalorder %s24_s22, %s1733_s23  ;;  %p1739_p2 = scmp.lt.s32.totalorder %s1733_s23, %s1733_s23 }
   0x5   :  { %p1740_p3 = por %p1739_p2, %p1738_p1 }
   0x7   :  { %p1741_p4 = pnand %p1740_p3, %p1734_p0 }
   0x9   :  { %1744 = shalt.err (!%p1741_p4)
}
   0xa   :  { %s1748_s24 = smov 256   ;;  %s1749_s25 = smov 16  }
   0xb   :  { %29 = dma.hbm_to_vmem [thread:$0]  %s2518_s3, 4096, %s24_s22, [#allocation3], %s1748_s24, %s1748_s24, %s1749_s25  }
   0xc   :  { %1745 = dma.done.wait [#allocation3], 4096  }
   0xd   :  { %1746 = vsyncadd [#allocation3], 4294963200  ;;  %v2522_v0 = vmov 0.0   ;;  %v75_v1 = vld [vmem:[%s2516_s1 + $0xe8] sm:$0xff]  ;;  %v77_v2 = vld [vmem:[%s2516_s1 + $0xf8] sm:$0xff]  ;;  %vm100_vm0 = vcmask 523264  }
   0xe   :  { %189 = vmatprep.mubr.f32.mxu0 %v2522_v0  ;;  %302 = vmatprep.mubr.f32.mxu1 %v2522_v0  ;;  %v74_v3 = vld [vmem:[%s2516_s1 + $0xe0] sm:$0xff]  ;;  %v76_v4 = vld [vmem:[%s2516_s1 + $0xf0] sm:$0xff]  ;;  %v71_v5 = vld [vmem:[%s2516_s1 + $0xc8] sm:$0xff]  ;;  %vm1752_vm1 = vmmov 0   ;;  %vm1451_vm2 = vcmask 39936  }
   0xf   :  { %141 = vmatprep.subr.mxu0 %v75_v1  ;;  %254 = vmatprep.subr.mxu1 %v77_v2  ;;  %v73_v6 = vld [vmem:[%s2516_s1 + $0xd8] sm:$0xff]  ;;  %v70_v7 = vld [vmem:[%s2516_s1 + $0xc0] sm:$0xff]  ;;  %v72_v8 = vld [vmem:[%s2516_s1 + $0xd0] sm:$0xff] }
  0x10   :  { %142 = vmatpush1.msra.mxu0 %v74_v3  ;;  %255 = vmatpush1.msra.mxu1 %v76_v4  ;;  %v67_v9 = vld [vmem:[%s2516_s1 + $0xa8] sm:$0xff]  ;;  %v69_v10 = vld [vmem:[%s2516_s1 + $0xb8] sm:$0xff]  ;;  %v66_v11 = vld [vmem:[%s2516_s1 + $0xa0] sm:$0xff] }
  0x11   :  { %143 = vmatprep.subr.mxu0 %v71_v5  ;;  %256 = vmatprep.subr.mxu1 %v73_v6  ;;  %v68_v12 = vld [vmem:[%s2516_s1 + $0xb0] sm:$0xff]  ;;  %v63_v13 = vld [vmem:[%s2516_s1 + $0x88] sm:$0xff]  ;;  %v65_v14 = vld [vmem:[%s2516_s1 + $0x98] sm:$0xff] }
  0x12   :  { %144 = vmatpush1.msra.mxu0 %v70_v7  ;;  %257 = vmatpush1.msra.mxu1 %v72_v8  ;;  %v62_v15 = vld [vmem:[%s2516_s1 + $0x80] sm:$0xff]  ;;  %v64_v16 = vld [vmem:[%s2516_s1 + $0x90] sm:$0xff]  ;;  %v59_v17 = vld [vmem:[%s2516_s1 + $0x68] sm:$0xff] }
  0x13   :  { %145 = vmatprep.subr.mxu0 %v67_v9  ;;  %258 = vmatprep.subr.mxu1 %v69_v10  ;;  %v61_v18 = vld [vmem:[%s2516_s1 + $0x78] sm:$0xff]  ;;  %v58_v19 = vld [vmem:[%s2516_s1 + $0x60] sm:$0xff]  ;;  %v60_v20 = vld [vmem:[%s2516_s1 + $0x70] sm:$0xff]  ;;  %v2524_v10 = vmov 0  }
  0x14   :  { %146 = vmatpush1.msra.mxu0 %v66_v11  ;;  %259 = vmatpush1.msra.mxu1 %v68_v12  ;;  %v55_v21 = vld [vmem:[%s2516_s1 + $0x48] sm:$0xff]  ;;  %v57_v22 = vld [vmem:[%s2516_s1 + $0x58] sm:$0xff]  ;;  %v54_v23 = vld [vmem:[%s2516_s1 + $0x40] sm:$0xff]  ;;  %v80_v11 = vlaneseq }
  0x15   :  { %147 = vmatprep.subr.mxu0 %v63_v13  ;;  %260 = vmatprep.subr.mxu1 %v65_v14  ;;  %v56_v24 = vld [vmem:[%s2516_s1 + $0x50] sm:$0xff]  ;;  %v51_v25 = vld [vmem:[%s2516_s1 + $0x28] sm:$0xff]  ;;  %v53_v26 = vld [vmem:[%s2516_s1 + $0x38] sm:$0xff] }
  0x16   :  { %148 = vmatpush1.msra.mxu0 %v62_v15  ;;  %261 = vmatpush1.msra.mxu1 %v64_v16  ;;  %v50_v27 = vld [vmem:[%s2516_s1 + $0x20] sm:$0xff]  ;;  %v52_v28 = vld [vmem:[%s2516_s1 + $0x30] sm:$0xff]  ;;  %v47_v29 = vld [vmem:[%s2516_s1 + $0x8] sm:$0xff]  ;;  %v81_v12 = vshrl.u32 %v80_v11, 7 }
  0x17   :  { %149 = vmatprep.subr.mxu0 %v59_v17  ;;  %262 = vmatprep.subr.mxu1 %v61_v18  ;;  %v49_v30 = vld [vmem:[%s2516_s1 + $0x18] sm:$0xff]  ;;  %v46_v31 = vld [vmem:[%s2516_s1] sm:$0xff]  ;;  %v48_v32 = vld [vmem:[%s2516_s1 + $0x10] sm:$0xff] }
  0x18   :  { %150 = vmatpush1.msra.mxu0 %v58_v19  ;;  %263 = vmatpush1.msra.mxu1 %v60_v20  ;;  %v38_v33 = vld [vmem:[%s2515_s0] sm:$0xff]  ;;  %v1894_v35 = vld [vmem:[#allocation2 + $0xec] ss:$16 sps:$4 sm:$0xff]   ;;  %v1898_v37 = vld [vmem:[#allocation2 + $0xe8] ss:$16 sps:$4 sm:$0xff]   ;;  %v82_v13 = vsub.s32 0, %v81_v12 }
  0x19   :  { %151 = vmatprep.subr.mxu0 %v55_v21  ;;  %264 = vmatprep.subr.mxu1 %v57_v22  ;;  %v1892_v34 = vld [vmem:[#allocation2 + $0xe4] ss:$16 sps:$4 sm:$0xff]   ;;  %v1896_v36 = vld [vmem:[#allocation2 + $0xe0] ss:$16 sps:$4 sm:$0xff]   ;;  %v39_v38 = vld [vmem:[%s2515_s0 + $0x8] sm:$0xff]  ;;  %v90_v14 = vsub.s32 2, %v81_v12 }
  0x1a   :  { %152 = vmatpush1.msra.mxu0 %v54_v23  ;;  %265 = vmatpush1.msra.mxu1 %v56_v24  ;;  %v1905_v39 = vld [vmem:[#allocation2 + $0xc4] ss:$16 sps:$4 sm:$0xff]   ;;  %v1909_v40 = vld [vmem:[#allocation2 + $0xcc] ss:$16 sps:$4 sm:$0xff]   ;;  %v1913_v41 = vld [vmem:[#allocation2 + $0xc0] ss:$16 sps:$4 sm:$0xff]  }
  0x1b   :  { %153 = vmatprep.subr.mxu0 %v51_v25  ;;  %266 = vmatprep.subr.mxu1 %v53_v26  ;;  %v1915_v42 = vld [vmem:[#allocation2 + $0xc8] ss:$16 sps:$4 sm:$0xff]   ;;  %v40_v43 = vld [vmem:[%s2515_s0 + $0x10] sm:$0xff]  ;;  %v1928_v45 = vld [vmem:[#allocation2 + $0xac] ss:$16 sps:$4 sm:$0xff]   ;;  %v86_v18 = vsub.s32 1, %v81_v12 }
  0x1c   :  { %154 = vmatpush1.msra.mxu0 %v50_v27  ;;  %267 = vmatpush1.msra.mxu1 %v52_v28  ;;  %v1926_v44 = vld [vmem:[#allocation2 + $0xa4] ss:$16 sps:$4 sm:$0xff]   ;;  %v1930_v46 = vld [vmem:[#allocation2 + $0xa0] ss:$16 sps:$4 sm:$0xff]   ;;  %v1934_v47 = vld [vmem:[#allocation2 + $0xa8] ss:$16 sps:$4 sm:$0xff]  }
  0x1d   :  { %155 = vmatprep.subr.mxu0 %v47_v29  ;;  %268 = vmatprep.subr.mxu1 %v49_v30  ;;  %v41_v48 = vld [vmem:[%s2515_s0 + $0x18] sm:$0xff]  ;;  %v1943_v49 = vld [vmem:[#allocation2 + $0x84] ss:$16 sps:$4 sm:$0xff]   ;;  %v1949_v51 = vld [vmem:[#allocation2 + $0x80] ss:$16 sps:$4 sm:$0xff]   ;;  %v94_v19 = vsub.s32 3, %v81_v12 }
  0x1e   :  { %156 = vmatpush1.msra.mxu0 %v46_v31  ;;  %269 = vmatpush1.msra.mxu1 %v48_v32  ;;  %v1945_v50 = vld [vmem:[#allocation2 + $0x8c] ss:$16 sps:$4 sm:$0xff]   ;;  %v1953_v52 = vld [vmem:[#allocation2 + $0x88] ss:$16 sps:$4 sm:$0xff]   ;;  %v42_v53 = vld [vmem:[%s2515_s0 + $0x20] sm:$0xff] }
  0x1f   :  { %1458 = vmatmul.mubr.msk.f32.vlgmr.msra.gmra.mxu0 %vm100_vm0, %v38_v33  ;;  %1466 = vmatmul.mubr.msk.f32.vlgmr.msra.gmra.mxu1 %vm100_vm0, %v38_v33  ;;  %v1962_v54 = vld [vmem:[#allocation2 + $0x64] ss:$16 sps:$4 sm:$0xff]   ;;  %v1966_v55 = vld [vmem:[#allocation2 + $0x6c] ss:$16 sps:$4 sm:$0xff]   ;;  %v1970_v56 = vld [vmem:[#allocation2 + $0x60] ss:$16 sps:$4 sm:$0xff]  }
  0x20   :  { %543 = vmatprep.subr.bf16.mxu0 %v1892_v34  ;;  %584 = vmatprep.subr.bf16.mxu1 %v1894_v35  ;;  %v1972_v57 = vld [vmem:[#allocation2 + $0x68] ss:$16 sps:$4 sm:$0xff]   ;;  %v1983_v59 = vld [vmem:[#allocation2 + $0x44] ss:$16 sps:$4 sm:$0xff]   ;;  %v1985_v60 = vld [vmem:[#allocation2 + $0x4c] ss:$16 sps:$4 sm:$0xff]  }
  0x21   :  { %544 = vmatpush1.bf16.msra.mxu0 %v1896_v36  ;;  %585 = vmatpush1.bf16.msra.mxu1 %v1898_v37  ;;  %v43_v58 = vld [vmem:[%s2515_s0 + $0x28] sm:$0xff]  ;;  %v1989_v61 = vld [vmem:[#allocation2 + $0x40] ss:$16 sps:$4 sm:$0xff]   ;;  %v2002_v1 = vld [vmem:[#allocation2 + $0x24] ss:$16 sps:$4 sm:$0xff]  }
  0x22   :  { %195 = vmatprep.mubr.f32.mxu0 %v2522_v0  ;;  %308 = vmatprep.mubr.f32.mxu1 %v2522_v0  ;;  %v1991_v62 = vld [vmem:[#allocation2 + $0x48] ss:$16 sps:$4 sm:$0xff]   ;;  %v44_v63 = vld [vmem:[%s2515_s0 + $0x30] sm:$0xff]  ;;  %v2004_v2 = vld [vmem:[#allocation2 + $0x2c] ss:$16 sps:$4 sm:$0xff]  }
  0x23   :  { %1459 = vmatmul.mubr.msk.f32.gmra.mxu0 %vm100_vm0, %v39_v38  ;;  %1467 = vmatmul.mubr.msk.f32.gmra.mxu1 %vm100_vm0, %v39_v38  ;;  %v2008_v3 = vld [vmem:[#allocation2 + $0x20] ss:$16 sps:$4 sm:$0xff]   ;;  %v2010_v4 = vld [vmem:[#allocation2 + $0x28] ss:$16 sps:$4 sm:$0xff]   ;;  %v2021_v6 = vld [vmem:[#allocation2 + $0x4] ss:$16 sps:$4 sm:$0xff]  }
  0x24   :  { %545 = vmatprep.subr.bf16.mxu0 %v1905_v39  ;;  %586 = vmatprep.subr.bf16.mxu1 %v1909_v40  ;;  %v45_v5 = vld [vmem:[%s2515_s0 + $0x38] sm:$0xff]  ;;  %v2027_v8 = vld [vmem:[#allocation2] ss:$16 sps:$4 sm:$0xff]  }
  0x25   :  { %546 = vmatpush1.bf16.msra.mxu0 %v1913_v41  ;;  %587 = vmatpush1.bf16.msra.mxu1 %v1915_v42  ;;  %v2023_v7 = vld [vmem:[#allocation2 + $0xc] ss:$16 sps:$4 sm:$0xff]   ;;  %v2029_v9 = vld [vmem:[#allocation2 + $0x8] ss:$16 sps:$4 sm:$0xff]   ;;  %v78_v15 = vld [vmem:[%s2517_s2] sm:$0xf] }
  0x26   :  { %201 = vmatprep.mubr.f32.mxu0 %v2522_v0  ;;  %314 = vmatprep.mubr.f32.mxu1 %v2522_v0  ;;  %v83_v22 = vrot.slane %v78_v15, %v82_v13  ;;  %v2090_v23 = vrot.slane %v78_v15, %v90_v14  ;;  %v87_v26 = vrot.slane %v78_v15, %v86_v18 }
  0x27   :  { %1460 = vmatmul.mubr.msk.f32.gmra.mxu0 %vm100_vm0, %v40_v43  ;;  %1468 = vmatmul.mubr.msk.f32.gmra.mxu1 %vm100_vm0, %v40_v43  ;;  %v2092_v27 = vrot.slane %v78_v15, %v94_v19 }
  0x28   :  { %547 = vmatprep.subr.bf16.mxu0 %v1926_v44  ;;  %588 = vmatprep.subr.bf16.mxu1 %v1928_v45 }
  0x29   :  { %548 = vmatpush1.bf16.msra.mxu0 %v1930_v46  ;;  %589 = vmatpush1.bf16.msra.mxu1 %v1934_v47 }
  0x2a   :  { %207 = vmatprep.mubr.f32.mxu0 %v2522_v0  ;;  %320 = vmatprep.mubr.f32.mxu1 %v2522_v0 }
  0x2b   :  { %1461 = vmatmul.mubr.msk.f32.gmra.mxu0 %vm100_vm0, %v41_v48  ;;  %1469 = vmatmul.mubr.msk.f32.gmra.mxu1 %vm100_vm0, %v41_v48 }
  0x2c   :  { %549 = vmatprep.subr.bf16.mxu0 %v1943_v49  ;;  %590 = vmatprep.subr.bf16.mxu1 %v1945_v50 }
  0x2d   :  { %550 = vmatpush1.bf16.msra.mxu0 %v1949_v51  ;;  %591 = vmatpush1.bf16.msra.mxu1 %v1953_v52 }
  0x2e   :  { %213 = vmatprep.mubr.f32.mxu0 %v2522_v0  ;;  %326 = vmatprep.mubr.f32.mxu1 %v2522_v0 }
  0x2f   :  { %1462 = vmatmul.mubr.msk.f32.gmra.mxu0 %vm100_vm0, %v42_v53  ;;  %1470 = vmatmul.mubr.msk.f32.gmra.mxu1 %vm100_vm0, %v42_v53 }
  0x30   :  { %551 = vmatprep.subr.bf16.mxu0 %v1962_v54  ;;  %592 = vmatprep.subr.bf16.mxu1 %v1966_v55 }
  0x31   :  { %552 = vmatpush1.bf16.msra.mxu0 %v1970_v56  ;;  %593 = vmatpush1.bf16.msra.mxu1 %v1972_v57 }
  0x32   :  { %219 = vmatprep.mubr.f32.mxu0 %v2522_v0  ;;  %332 = vmatprep.mubr.f32.mxu1 %v2522_v0 }
  0x33   :  { %1463 = vmatmul.mubr.msk.f32.gmra.mxu0 %vm100_vm0, %v43_v58  ;;  %1471 = vmatmul.mubr.msk.f32.gmra.mxu1 %vm100_vm0, %v43_v58 }
  0x34   :  { %553 = vmatprep.subr.bf16.mxu0 %v1983_v59  ;;  %594 = vmatprep.subr.bf16.mxu1 %v1985_v60 }
  0x35   :  { %554 = vmatpush1.bf16.msra.mxu0 %v1989_v61  ;;  %595 = vmatpush1.bf16.msra.mxu1 %v1991_v62 }
  0x36   :  { %225 = vmatprep.mubr.f32.mxu0 %v2522_v0  ;;  %338 = vmatprep.mubr.f32.mxu1 %v2522_v0 }
  0x37   :  { %1464 = vmatmul.mubr.msk.f32.gmra.mxu0 %vm100_vm0, %v44_v63  ;;  %1472 = vmatmul.mubr.msk.f32.gmra.mxu1 %vm100_vm0, %v44_v63 }
  0x38   :  { %555 = vmatprep.subr.bf16.mxu0 %v2002_v1  ;;  %596 = vmatprep.subr.bf16.mxu1 %v2004_v2 }
  0x39   :  { %556 = vmatpush1.bf16.msra.mxu0 %v2008_v3  ;;  %597 = vmatpush1.bf16.msra.mxu1 %v2010_v4 }
  0x3a   :  { %231 = vmatprep.mubr.f32.mxu0 %v2522_v0  ;;  %344 = vmatprep.mubr.f32.mxu1 %v2522_v0 }
  0x3b   :  { %1465 = vmatmul.mubr.msk.f32.gmra.mxu0 %vm100_vm0, %v45_v5  ;;  %1473 = vmatmul.mubr.msk.f32.gmra.mxu1 %vm100_vm0, %v45_v5 }
  0x3c   :  { %557 = vmatprep.subr.bf16.mxu0 %v2021_v6  ;;  %598 = vmatprep.subr.bf16.mxu1 %v2023_v7 }
  0x3d   :  { %558 = vmatpush1.bf16.msra.mxu0 %v2027_v8  ;;  %599 = vmatpush1.bf16.msra.mxu1 %v2029_v9 }
  0x3e   :  { %575 = vmatprep.mubr.bf16.mxu0 %v2524_v10  ;;  %616 = vmatprep.mubr.bf16.mxu1 %v2524_v10 }
  0x3f   :  { %645 = vmatprep.subr.bf16.mxu0 %v1892_v34  ;;  %686 = vmatprep.subr.bf16.mxu1 %v1894_v35 }
  0x40   :  { %576 = vmatmul.mubr.bf16.vlgmr.msra.gmra.mxu0 %v2524_v10  ;;  %617 = vmatmul.mubr.bf16.vlgmr.msra.gmra.mxu1 %v2524_v10 }
  0x41   :  { %646 = vmatpush1.bf16.msra.mxu0 %v1896_v36  ;;  %687 = vmatpush1.bf16.msra.mxu1 %v1898_v37 }
  0x42   :  { %647 = vmatprep.subr.bf16.mxu0 %v1905_v39  ;;  %688 = vmatprep.subr.bf16.mxu1 %v1909_v40 }
  0x43   :  { %677 = vmatprep.mubr.bf16.mxu0 %v2524_v10  ;;  %718 = vmatprep.mubr.bf16.mxu1 %v2524_v10 }
  0x45   :  { %648 = vmatpush1.bf16.msra.mxu0 %v1913_v41  ;;  %689 = vmatpush1.bf16.msra.mxu1 %v1915_v42 }
  0x46   :  { %649 = vmatprep.subr.bf16.mxu0 %v1926_v44  ;;  %690 = vmatprep.subr.bf16.mxu1 %v1928_v45 }
  0x49   :  { %650 = vmatpush1.bf16.msra.mxu0 %v1930_v46  ;;  %691 = vmatpush1.bf16.msra.mxu1 %v1934_v47 }
  0x4a   :  { %651 = vmatprep.subr.bf16.mxu0 %v1943_v49  ;;  %692 = vmatprep.subr.bf16.mxu1 %v1945_v50 }
  0x4d   :  { %652 = vmatpush1.bf16.msra.mxu0 %v1949_v51  ;;  %693 = vmatpush1.bf16.msra.mxu1 %v1953_v52 }
  0x4e   :  { %653 = vmatprep.subr.bf16.mxu0 %v1962_v54  ;;  %694 = vmatprep.subr.bf16.mxu1 %v1966_v55 }
  0x51   :  { %654 = vmatpush1.bf16.msra.mxu0 %v1970_v56  ;;  %695 = vmatpush1.bf16.msra.mxu1 %v1972_v57 }
  0x52   :  { %655 = vmatprep.subr.bf16.mxu0 %v1983_v59  ;;  %696 = vmatprep.subr.bf16.mxu1 %v1985_v60 }
  0x55   :  { %656 = vmatpush1.bf16.msra.mxu0 %v1989_v61  ;;  %697 = vmatpush1.bf16.msra.mxu1 %v1991_v62 }
  0x56   :  { %657 = vmatprep.subr.bf16.mxu0 %v2002_v1  ;;  %698 = vmatprep.subr.bf16.mxu1 %v2004_v2 }
  0x59   :  { %658 = vmatpush1.bf16.msra.mxu0 %v2008_v3  ;;  %699 = vmatpush1.bf16.msra.mxu1 %v2010_v4 }
  0x5a   :  { %659 = vmatprep.subr.bf16.mxu0 %v2021_v6  ;;  %700 = vmatprep.subr.bf16.mxu1 %v2023_v7 }
  0x5d   :  { %660 = vmatpush1.bf16.msra.mxu0 %v2027_v8  ;;  %701 = vmatpush1.bf16.msra.mxu1 %v2029_v9 }
  0x5e   :  { %747 = vmatprep.subr.bf16.mxu0 %v1892_v34  ;;  %788 = vmatprep.subr.bf16.mxu1 %v1894_v35 }
  0xdf   :  { %v2082_v16 = vpop.f32.mrf.mxu0  ;;  %v2084_v17 = vpop.f32.mrf.mxu1 }
  0xe1   :  { %v2086_v20 = vpop.f32.mrf.mxu0  ;;  %v2088_v21 = vpop.f32.mrf.mxu1 }
  0xe3   :  { %v197_v24 = vpop.f32.mrf.mxu0  ;;  %v310_v25 = vpop.f32.mrf.mxu1 }
  0xe4   :  { %v2094_v28 = vadd.f32 %v197_v24, %v83_v22  ;;  %v2097_v29 = vadd.f32 %v310_v25, %v2090_v23 }
  0xe5   :  { %v199_v30 = vpop.f32.mrf.mxu0  ;;  %v312_v31 = vpop.f32.mrf.mxu1 }
  0xe6   :  { %v2099_v32 = vadd.f32 %v199_v30, %v87_v26  ;;  %v2102_v33 = vadd.f32 %v312_v31, %v2092_v27 }
  0xe7   :  { %v203_v38 = vpop.f32.mrf.mxu0  ;;  %v316_v43 = vpop.f32.mrf.mxu1 }
  0xe8   :  { %v2104_v48 = vadd.f32 %v203_v38, %v83_v22  ;;  %v2107_v53 = vadd.f32 %v316_v43, %v2090_v23 }
  0xe9   :  { %v205_v58 = vpop.f32.mrf.mxu0  ;;  %v318_v63 = vpop.f32.mrf.mxu1 }
  0xea   :  { %v2109_v5 = vadd.f32 %v205_v58, %v87_v26  ;;  %v2112_v11 = vadd.f32 %v318_v63, %v2092_v27 }
  0xeb   :  { %v209_v12 = vpop.f32.mrf.mxu0  ;;  %v322_v13 = vpop.f32.mrf.mxu1 }
  0xec   :  { %v2114_v14 = vadd.f32 %v209_v12, %v83_v22  ;;  %v2117_v15 = vadd.f32 %v322_v13, %v2090_v23 }
  0xed   :  { %v211_v18 = vpop.f32.mrf.mxu0  ;;  %v324_v19 = vpop.f32.mrf.mxu1 }
  0xee   :  { %2526 = vst [vmem:[#allocation5_spill] sm:$0xff] %v2117_v15  ;;  %v2119_v24 = vadd.f32 %v211_v18, %v87_v26  ;;  %v2122_v25 = vadd.f32 %v324_v19, %v2092_v27 }
  0xef   :  { %v215_v30 = vpop.f32.mrf.mxu0  ;;  %v328_v31 = vpop.f32.mrf.mxu1 }
  0xf0   :  { %2527 = vst [vmem:[#allocation6_spill] sm:$0xff] %v2119_v24  ;;  %2528 = vst [vmem:[#allocation7_spill] sm:$0xff] %v2122_v25  ;;  %v2124_v38 = vadd.f32 %v215_v30, %v83_v22  ;;  %v2127_v43 = vadd.f32 %v328_v31, %v2090_v23 }
  0xf1   :  { %v217_v58 = vpop.f32.mrf.mxu0  ;;  %v330_v63 = vpop.f32.mrf.mxu1 }
  0xf2   :  { %2529 = vst [vmem:[#allocation8_spill] sm:$0xff] %v2124_v38  ;;  %2530 = vst [vmem:[#allocation9_spill] sm:$0xff] %v2127_v43  ;;  %v2129_v12 = vadd.f32 %v217_v58, %v87_v26  ;;  %v2132_v13 = vadd.f32 %v330_v63, %v2092_v27 }
  0xf3   :  { %v221_v0 = vpop.f32.mrf.mxu0  ;;  %v334_v18 = vpop.f32.mrf.mxu1 }
  0xf4   :  { %2531 = vst [vmem:[#allocation10_spill] sm:$0xff] %v2129_v12  ;;  %2532 = vst [vmem:[#allocation11_spill] sm:$0xff] %v2132_v13  ;;  %v2134_v10 = vadd.f32 %v221_v0, %v83_v22  ;;  %v2137_v19 = vadd.f32 %v334_v18, %v2090_v23 }
  0xf5   :  { %v223_v25 = vpop.f32.mrf.mxu0  ;;  %v336_v30 = vpop.f32.mrf.mxu1 }
  0xf6   :  { %2533 = vst [vmem:[#allocation12_spill] sm:$0xff] %v2134_v10  ;;  %2534 = vst [vmem:[#allocation13_spill] sm:$0xff] %v2137_v19  ;;  %v2139_v38 = vadd.f32 %v223_v25, %v87_v26  ;;  %v2142_v31 = vadd.f32 %v336_v30, %v2092_v27 }
  0xf7   :  { %v227_v43 = vpop.f32.mrf.mxu0  ;;  %v340_v58 = vpop.f32.mrf.mxu1 }
  0xf8   :  { %2535 = vst [vmem:[#allocation14_spill] sm:$0xff] %v2139_v38  ;;  %2536 = vst [vmem:[#allocation15_spill] sm:$0xff] %v2142_v31  ;;  %v2144_v12 = vadd.f32 %v227_v43, %v83_v22  ;;  %v2147_v63 = vadd.f32 %v340_v58, %v2090_v23 }
  0xf9   :  { %v229_v13 = vpop.f32.mrf.mxu0  ;;  %v342_v0 = vpop.f32.mrf.mxu1 }
  0xfa   :  { %2537 = vst [vmem:[#allocation16_spill] sm:$0xff] %v2144_v12  ;;  %2538 = vst [vmem:[#allocation17_spill] sm:$0xff] %v2147_v63  ;;  %v2149_v10 = vadd.f32 %v229_v13, %v87_v26  ;;  %v2152_v18 = vadd.f32 %v342_v0, %v2092_v27  ;;  %v192_v13 = vadd.f32 %v2082_v16, %v83_v22 }
  0xfb   :  { %v233_v19 = vpop.f32.mrf.mxu0  ;;  %v346_v25 = vpop.f32.mrf.mxu1  ;;  %v194_v0 = vadd.f32 %v2086_v20, %v87_v26  ;;  %v307_v16 = vadd.f32 %v2088_v21, %v2092_v27 }
  0xfc   :  { %2539 = vst [vmem:[#allocation18_spill] sm:$0xff] %v2149_v10  ;;  %2540 = vst [vmem:[#allocation19_spill] sm:$0xff] %v2152_v18  ;;  %v2154_v38 = vadd.f32 %v233_v19, %v83_v22  ;;  %v2157_v30 = vadd.f32 %v346_v25, %v2090_v23  ;;  %v305_v25 = vadd.f32 %v2084_v17, %v2090_v23 }
  0xfd   :  { %v235_v31 = vpop.f32.mrf.mxu0  ;;  %v348_v43 = vpop.f32.mrf.mxu1 }
  0xfe   :  { %2541 = vst [vmem:[#allocation20_spill] sm:$0xff] %v2154_v38  ;;  %2542 = vst [vmem:[#allocation21_spill] sm:$0xff] %v2157_v30  ;;  %v2159_v12 = vadd.f32 %v235_v31, %v87_v26  ;;  %v2162_v58 = vadd.f32 %v348_v43, %v2092_v27 }
 0x100   :  { %2543 = vst [vmem:[#allocation22_spill] sm:$0xff] %v2159_v12  ;;  %2544 = vst [vmem:[#allocation23_spill] sm:$0xff] %v2162_v58  ;;  %v577_v10 = vpop.f32.mrf.mxu0  ;;  %v618_v63 = vpop.f32.mrf.mxu1 }
 0x101   :  { %v625_v18 = vadd.f32 %v577_v10, %v192_v13  ;;  %v627_v12 = vadd.f32 %v618_v63, %v305_v25 }
 0x102   :  { %v579_v24 = vpop.f32.mrf.mxu0  ;;  %v620_v19 = vpop.f32.mrf.mxu1 }
 0x103   :  { %1613 = vtanh.f32 %v625_v18  ;;  %v626_v30 = vadd.f32 %v579_v24, %v194_v0  ;;  %v628_v22 = vadd.f32 %v620_v19, %v307_v16 }
 0x104   :  { %v581_v38 = vpop.f32.mrf.mxu0  ;;  %v622_v31 = vpop.f32.mrf.mxu1 }
 0x105   :  { %1615 = vtanh.f32 %v626_v30 }
 0x106   :  { %v582_v43 = vpop.f32.mrf.mxu0  ;;  %v623_v58 = vpop.f32.mrf.mxu1  ;;  %1617 = vtanh.f32 %v627_v12 }
 0x107   :  { %1619 = vtanh.f32 %v628_v22 }
 0x110   :  { %v1614_v20 = vpop.eup %1613 }
 0x111   :  { %v633_v10 = vmul.f32 0.5, %v1614_v20 }
 0x112   :  { %v1616_v26 = vpop.eup %1615 }
 0x113   :  { %v634_v13 = vadd.f32 0.5, %v633_v10  ;;  %v635_v15 = vmul.f32 0.5, %v1616_v26  ;;  %v1618_v23 = vpop.eup %1617 }
 0x114   :  { %v1620_v63 = vpop.eup %1619 }
 0x115   :  { %v636_v17 = vadd.f32 0.5, %v635_v15  ;;  %v640_v38 = vmul.f32 %v1618_v23, %v634_v13  ;;  %v637_v12 = vmul.f32 0.5, %v1620_v63  ;;  %v2545_v15 = vmov 0  }
 0x117   :  { %v639_v24 = vmul.f32 0.0, %v636_v17  ;;  %v638_v30 = vadd.f32 0.5, %v637_v12 }
 0x119   :  { %v2170_v18 = vadd.f32 %v640_v38, %v639_v24 }
 0x11b   :  { %1621 = vtanh.f32 %v2170_v18 }
 0x128   :  { %v1622_v58 = vpop.eup %1621 }
 0x129   :  { %v643_v21 = vmul.f32 %v1622_v58, %v638_v30 }
 0x12b   :  { %v644_v27 = vpack.c.bf16 %v643_v21, %v643_v21 }
 0x12d   :  { %678 = vmatmul.mubr.bf16.vlgmr.msra.gmra.mxu0 %v644_v27  ;;  %719 = vmatmul.mubr.bf16.vlgmr.msra.gmra.mxu1 %v644_v27 }
 0x12e   :  { %748 = vmatpush1.bf16.msra.mxu0 %v1896_v36  ;;  %789 = vmatpush1.bf16.msra.mxu1 %v1898_v37 }
 0x12f   :  { %749 = vmatprep.subr.bf16.mxu0 %v1905_v39  ;;  %790 = vmatprep.subr.bf16.mxu1 %v1909_v40 }
 0x130   :  { %779 = vmatprep.mubr.bf16.mxu0 %v2545_v15  ;;  %820 = vmatprep.mubr.bf16.mxu1 %v2545_v15 }
 0x132   :  { %750 = vmatpush1.bf16.msra.mxu0 %v1913_v41  ;;  %791 = vmatpush1.bf16.msra.mxu1 %v1915_v42 }
 0x133   :  { %751 = vmatprep.subr.bf16.mxu0 %v1926_v44  ;;  %792 = vmatprep.subr.bf16.mxu1 %v1928_v45 }
 0x136   :  { %752 = vmatpush1.bf16.msra.mxu0 %v1930_v46  ;;  %793 = vmatpush1.bf16.msra.mxu1 %v1934_v47 }
 0x137   :  { %753 = vmatprep.subr.bf16.mxu0 %v1943_v49  ;;  %794 = vmatprep.subr.bf16.mxu1 %v1945_v50 }
 0x13a   :  { %754 = vmatpush1.bf16.msra.mxu0 %v1949_v51  ;;  %795 = vmatpush1.bf16.msra.mxu1 %v1953_v52 }
 0x13b   :  { %755 = vmatprep.subr.bf16.mxu0 %v1962_v54  ;;  %796 = vmatprep.subr.bf16.mxu1 %v1966_v55 }
 0x13e   :  { %756 = vmatpush1.bf16.msra.mxu0 %v1970_v56  ;;  %797 = vmatpush1.bf16.msra.mxu1 %v1972_v57 }
 0x13f   :  { %757 = vmatprep.subr.bf16.mxu0 %v1983_v59  ;;  %798 = vmatprep.subr.bf16.mxu1 %v1985_v60 }
 0x142   :  { %758 = vmatpush1.bf16.msra.mxu0 %v1989_v61  ;;  %799 = vmatpush1.bf16.msra.mxu1 %v1991_v62 }
 0x143   :  { %759 = vmatprep.subr.bf16.mxu0 %v2002_v1  ;;  %800 = vmatprep.subr.bf16.mxu1 %v2004_v2 }
 0x146   :  { %760 = vmatpush1.bf16.msra.mxu0 %v2008_v3  ;;  %801 = vmatpush1.bf16.msra.mxu1 %v2010_v4 }
 0x147   :  { %761 = vmatprep.subr.bf16.mxu0 %v2021_v6  ;;  %802 = vmatprep.subr.bf16.mxu1 %v2023_v7 }
 0x14a   :  { %762 = vmatpush1.bf16.msra.mxu0 %v2027_v8  ;;  %803 = vmatpush1.bf16.msra.mxu1 %v2029_v9 }
 0x14b   :  { %849 = vmatprep.subr.bf16.mxu0 %v1892_v34  ;;  %890 = vmatprep.subr.bf16.mxu1 %v1894_v35 }
 0x1ed   :  { %v679_v0 = vpop.f32.mrf.mxu0  ;;  %v720_v19 = vpop.f32.mrf.mxu1 }
 0x1ee   :  { %v727_v25 = vadd.f32 %v679_v0, %v2094_v28  ;;  %v729_v16 = vadd.f32 %v720_v19, %v2097_v29 }
 0x1ef   :  { %v681_v31 = vpop.f32.mrf.mxu0  ;;  %v722_v43 = vpop.f32.mrf.mxu1 }
 0x1f0   :  { %1623 = vtanh.f32 %v727_v25  ;;  %v728_v22 = vadd.f32 %v681_v31, %v2099_v32  ;;  %v730_v17 = vadd.f32 %v722_v43, %v2102_v33 }
 0x1f1   :  { %v683_v20 = vpop.f32.mrf.mxu0  ;;  %v724_v10 = vpop.f32.mrf.mxu1 }
 0x1f2   :  { %1625 = vtanh.f32 %v728_v22 }
 0x1f3   :  { %v684_v26 = vpop.f32.mrf.mxu0  ;;  %v725_v13 = vpop.f32.mrf.mxu1  ;;  %1627 = vtanh.f32 %v729_v16 }
 0x1f4   :  { %1629 = vtanh.f32 %v730_v17 }
 0x1fd   :  { %v1624_v23 = vpop.eup %1623 }
 0x1fe   :  { %v735_v24 = vmul.f32 0.5, %v1624_v23 }
 0x1ff   :  { %v1626_v38 = vpop.eup %1625 }
 0x200   :  { %v736_v63 = vadd.f32 0.5, %v735_v24  ;;  %v737_v28 = vmul.f32 0.5, %v1626_v38  ;;  %v1628_v12 = vpop.eup %1627 }
 0x201   :  { %v1630_v21 = vpop.eup %1629 }
 0x202   :  { %v738_v30 = vadd.f32 0.5, %v737_v28  ;;  %v742_v58 = vmul.f32 %v1628_v12, %v736_v63  ;;  %v739_v27 = vmul.f32 0.5, %v1630_v21 }
 0x204   :  { %v741_v29 = vmul.f32 %v738_v30, %v2170_v18  ;;  %v740_v0 = vadd.f32 0.5, %v739_v27 }
 0x206   :  { %v2212_v32 = vadd.f32 %v742_v58, %v741_v29 }
 0x208   :  { %1631 = vtanh.f32 %v2212_v32 }
 0x215   :  { %v1632_v19 = vpop.eup %1631 }
 0x216   :  { %v745_v33 = vmul.f32 %v1632_v19, %v740_v0 }
 0x218   :  { %v746_v25 = vpack.c.bf16 %v745_v33, %v745_v33 }
 0x21a   :  { %780 = vmatmul.mubr.bf16.vlgmr.msra.gmra.mxu0 %v746_v25  ;;  %821 = vmatmul.mubr.bf16.vlgmr.msra.gmra.mxu1 %v746_v25 }
 0x21b   :  { %850 = vmatpush1.bf16.msra.mxu0 %v1896_v36  ;;  %891 = vmatpush1.bf16.msra.mxu1 %v1898_v37 }
 0x21c   :  { %851 = vmatprep.subr.bf16.mxu0 %v1905_v39  ;;  %892 = vmatprep.subr.bf16.mxu1 %v1909_v40 }
 0x21d   :  { %881 = vmatprep.mubr.bf16.mxu0 %v2545_v15  ;;  %922 = vmatprep.mubr.bf16.mxu1 %v2545_v15 }
 0x21f   :  { %852 = vmatpush1.bf16.msra.mxu0 %v1913_v41  ;;  %893 = vmatpush1.bf16.msra.mxu1 %v1915_v42 }
 0x220   :  { %853 = vmatprep.subr.bf16.mxu0 %v1926_v44  ;;  %894 = vmatprep.subr.bf16.mxu1 %v1928_v45 }
 0x223   :  { %854 = vmatpush1.bf16.msra.mxu0 %v1930_v46  ;;  %895 = vmatpush1.bf16.msra.mxu1 %v1934_v47 }
 0x224   :  { %855 = vmatprep.subr.bf16.mxu0 %v1943_v49  ;;  %896 = vmatprep.subr.bf16.mxu1 %v1945_v50 }
 0x227   :  { %856 = vmatpush1.bf16.msra.mxu0 %v1949_v51  ;;  %897 = vmatpush1.bf16.msra.mxu1 %v1953_v52 }
 0x228   :  { %857 = vmatprep.subr.bf16.mxu0 %v1962_v54  ;;  %898 = vmatprep.subr.bf16.mxu1 %v1966_v55 }
 0x22b   :  { %858 = vmatpush1.bf16.msra.mxu0 %v1970_v56  ;;  %899 = vmatpush1.bf16.msra.mxu1 %v1972_v57 }
 0x22c   :  { %859 = vmatprep.subr.bf16.mxu0 %v1983_v59  ;;  %900 = vmatprep.subr.bf16.mxu1 %v1985_v60 }
 0x22f   :  { %860 = vmatpush1.bf16.msra.mxu0 %v1989_v61  ;;  %901 = vmatpush1.bf16.msra.mxu1 %v1991_v62 }
 0x230   :  { %861 = vmatprep.subr.bf16.mxu0 %v2002_v1  ;;  %902 = vmatprep.subr.bf16.mxu1 %v2004_v2 }
 0x233   :  { %862 = vmatpush1.bf16.msra.mxu0 %v2008_v3  ;;  %903 = vmatpush1.bf16.msra.mxu1 %v2010_v4 }
 0x234   :  { %863 = vmatprep.subr.bf16.mxu0 %v2021_v6  ;;  %904 = vmatprep.subr.bf16.mxu1 %v2023_v7 }
 0x237   :  { %864 = vmatpush1.bf16.msra.mxu0 %v2027_v8  ;;  %905 = vmatpush1.bf16.msra.mxu1 %v2029_v9 }
 0x238   :  { %951 = vmatprep.subr.bf16.mxu0 %v1892_v34  ;;  %992 = vmatprep.subr.bf16.mxu1 %v1894_v35 }
 0x2da   :  { %v781_v18 = vpop.f32.mrf.mxu0  ;;  %v822_v31 = vpop.f32.mrf.mxu1 }
 0x2db   :  { %v829_v43 = vadd.f32 %v781_v18, %v2104_v48  ;;  %v831_v20 = vadd.f32 %v822_v31, %v2107_v53 }
 0x2dc   :  { %v783_v16 = vpop.f32.mrf.mxu0  ;;  %v824_v22 = vpop.f32.mrf.mxu1 }
 0x2dd   :  { %1633 = vtanh.f32 %v829_v43  ;;  %v830_v10 = vadd.f32 %v783_v16, %v2109_v5  ;;  %v832_v24 = vadd.f32 %v824_v22, %v2112_v11  ;;  %v2546_v16 = vld [vmem:[#allocation5_spill] sm:$0xff] }
 0x2de   :  { %v785_v26 = vpop.f32.mrf.mxu0  ;;  %v826_v13 = vpop.f32.mrf.mxu1 }
 0x2df   :  { %1635 = vtanh.f32 %v830_v10 }
 0x2e0   :  { %v786_v17 = vpop.f32.mrf.mxu0  ;;  %v827_v23 = vpop.f32.mrf.mxu1  ;;  %1637 = vtanh.f32 %v831_v20  ;;  %v2547_v20 = vld [vmem:[#allocation6_spill] sm:$0xff] }
 0x2e1   :  { %1639 = vtanh.f32 %v832_v24 }
 0x2ea   :  { %v1634_v38 = vpop.eup %1633 }
 0x2eb   :  { %v837_v63 = vmul.f32 0.5, %v1634_v38 }
 0x2ec   :  { %v1636_v28 = vpop.eup %1635 }
 0x2ed   :  { %v838_v12 = vadd.f32 0.5, %v837_v63  ;;  %v839_v48 = vmul.f32 0.5, %v1636_v28  ;;  %v1638_v30 = vpop.eup %1637 }
 0x2ee   :  { %v1640_v21 = vpop.eup %1639 }
 0x2ef   :  { %v840_v58 = vadd.f32 0.5, %v839_v48  ;;  %v844_v29 = vmul.f32 %v1638_v30, %v838_v12  ;;  %v841_v27 = vmul.f32 0.5, %v1640_v21 }
 0x2f1   :  { %v843_v53 = vmul.f32 %v840_v58, %v2212_v32  ;;  %v842_v0 = vadd.f32 0.5, %v841_v27 }
 0x2f3   :  { %v2254_v5 = vadd.f32 %v844_v29, %v843_v53 }
 0x2f5   :  { %1641 = vtanh.f32 %v2254_v5 }
 0x302   :  { %v1642_v19 = vpop.eup %1641 }
 0x303   :  { %v847_v11 = vmul.f32 %v1642_v19, %v842_v0 }
 0x305   :  { %v848_v33 = vpack.c.bf16 %v847_v11, %v847_v11 }
 0x307   :  { %882 = vmatmul.mubr.bf16.vlgmr.msra.gmra.mxu0 %v848_v33  ;;  %923 = vmatmul.mubr.bf16.vlgmr.msra.gmra.mxu1 %v848_v33 }
 0x308   :  { %952 = vmatpush1.bf16.msra.mxu0 %v1896_v36  ;;  %993 = vmatpush1.bf16.msra.mxu1 %v1898_v37 }
 0x309   :  { %953 = vmatprep.subr.bf16.mxu0 %v1905_v39  ;;  %994 = vmatprep.subr.bf16.mxu1 %v1909_v40 }
 0x30a   :  { %983 = vmatprep.mubr.bf16.mxu0 %v2545_v15  ;;  %1024 = vmatprep.mubr.bf16.mxu1 %v2545_v15 }
 0x30c   :  { %954 = vmatpush1.bf16.msra.mxu0 %v1913_v41  ;;  %995 = vmatpush1.bf16.msra.mxu1 %v1915_v42 }
 0x30d   :  { %955 = vmatprep.subr.bf16.mxu0 %v1926_v44  ;;  %996 = vmatprep.subr.bf16.mxu1 %v1928_v45 }
 0x310   :  { %956 = vmatpush1.bf16.msra.mxu0 %v1930_v46  ;;  %997 = vmatpush1.bf16.msra.mxu1 %v1934_v47 }
 0x311   :  { %957 = vmatprep.subr.bf16.mxu0 %v1943_v49  ;;  %998 = vmatprep.subr.bf16.mxu1 %v1945_v50 }
 0x314   :  { %958 = vmatpush1.bf16.msra.mxu0 %v1949_v51  ;;  %999 = vmatpush1.bf16.msra.mxu1 %v1953_v52 }
 0x315   :  { %959 = vmatprep.subr.bf16.mxu0 %v1962_v54  ;;  %1000 = vmatprep.subr.bf16.mxu1 %v1966_v55 }
 0x318   :  { %960 = vmatpush1.bf16.msra.mxu0 %v1970_v56  ;;  %1001 = vmatpush1.bf16.msra.mxu1 %v1972_v57 }
 0x319   :  { %961 = vmatprep.subr.bf16.mxu0 %v1983_v59  ;;  %1002 = vmatprep.subr.bf16.mxu1 %v1985_v60 }
 0x31c   :  { %962 = vmatpush1.bf16.msra.mxu0 %v1989_v61  ;;  %1003 = vmatpush1.bf16.msra.mxu1 %v1991_v62 }
 0x31d   :  { %963 = vmatprep.subr.bf16.mxu0 %v2002_v1  ;;  %1004 = vmatprep.subr.bf16.mxu1 %v2004_v2 }
 0x320   :  { %964 = vmatpush1.bf16.msra.mxu0 %v2008_v3  ;;  %1005 = vmatpush1.bf16.msra.mxu1 %v2010_v4 }
 0x321   :  { %965 = vmatprep.subr.bf16.mxu0 %v2021_v6  ;;  %1006 = vmatprep.subr.bf16.mxu1 %v2023_v7 }
 0x324   :  { %966 = vmatpush1.bf16.msra.mxu0 %v2027_v8  ;;  %1007 = vmatpush1.bf16.msra.mxu1 %v2029_v9 }
 0x325   :  { %1053 = vmatprep.subr.bf16.mxu0 %v1892_v34  ;;  %1094 = vmatprep.subr.bf16.mxu1 %v1894_v35  ;;  %v2548_v34 = vld [vmem:[#allocation7_spill] sm:$0xff] }
 0x3c7   :  { %v883_v32 = vpop.f32.mrf.mxu0  ;;  %v924_v25 = vpop.f32.mrf.mxu1 }
 0x3c8   :  { %v931_v18 = vadd.f32 %v883_v32, %v2114_v14  ;;  %v933_v22 = vadd.f32 %v924_v25, %v2546_v16  ;;  %v2552_v32 = vld [vmem:[#allocation11_spill] sm:$0xff] }
 0x3c9   :  { %v885_v31 = vpop.f32.mrf.mxu0  ;;  %v926_v43 = vpop.f32.mrf.mxu1 }
 0x3ca   :  { %1643 = vtanh.f32 %v931_v18  ;;  %v932_v10 = vadd.f32 %v885_v31, %v2547_v20  ;;  %v934_v24 = vadd.f32 %v926_v43, %v2548_v34 }
 0x3cb   :  { %v887_v26 = vpop.f32.mrf.mxu0  ;;  %v928_v13 = vpop.f32.mrf.mxu1 }
 0x3cc   :  { %1645 = vtanh.f32 %v932_v10 }
 0x3cd   :  { %v888_v17 = vpop.f32.mrf.mxu0  ;;  %v929_v23 = vpop.f32.mrf.mxu1  ;;  %1647 = vtanh.f32 %v933_v22 }
 0x3ce   :  { %1649 = vtanh.f32 %v934_v24 }
 0x3d7   :  { %v1644_v35 = vpop.eup %1643 }
 0x3d8   :  { %v939_v38 = vmul.f32 0.5, %v1644_v35 }
 0x3d9   :  { %v1646_v63 = vpop.eup %1645 }
 0x3da   :  { %v940_v28 = vadd.f32 0.5, %v939_v38  ;;  %v941_v14 = vmul.f32 0.5, %v1646_v63  ;;  %v1648_v12 = vpop.eup %1647 }
 0x3db   :  { %v1650_v53 = vpop.eup %1649 }
 0x3dc   :  { %v942_v48 = vadd.f32 0.5, %v941_v14  ;;  %v946_v30 = vmul.f32 %v1648_v12, %v940_v28  ;;  %v943_v21 = vmul.f32 0.5, %v1650_v53  ;;  %v2345_v28 = vld [vmem:[#allocation2 + $0xe0] ss:$16 sps:$4 sm:$0xff]   ;;  %v2348_v14 = vld [vmem:[#allocation2 + $0xe8] ss:$16 sps:$4 sm:$0xff]  }
 0x3dd   :  { %v2351_v12 = vld [vmem:[#allocation2 + $0xc4] ss:$16 sps:$4 sm:$0xff]   ;;  %v2368_v53 = vld [vmem:[#allocation2 + $0xac] ss:$16 sps:$4 sm:$0xff]  }
 0x3de   :  { %v945_v58 = vmul.f32 %v942_v48, %v2254_v5  ;;  %v944_v27 = vadd.f32 0.5, %v943_v21  ;;  %v2354_v48 = vld [vmem:[#allocation2 + $0xcc] ss:$16 sps:$4 sm:$0xff]   ;;  %v2371_v21 = vld [vmem:[#allocation2 + $0xa0] ss:$16 sps:$4 sm:$0xff]  }
 0x3e0   :  { %v2296_v29 = vadd.f32 %v946_v30, %v945_v58  ;;  %v2359_v30 = vld [vmem:[#allocation2 + $0xc0] ss:$16 sps:$4 sm:$0xff]   ;;  %v2362_v58 = vld [vmem:[#allocation2 + $0xc8] ss:$16 sps:$4 sm:$0xff]  }
 0x3e2   :  { %1651 = vtanh.f32 %v2296_v29 }
 0x3ef   :  { %v1652_v0 = vpop.eup %1651 }
 0x3f0   :  { %v949_v19 = vmul.f32 %v1652_v0, %v944_v27  ;;  %v2374_v27 = vld [vmem:[#allocation2 + $0xa8] ss:$16 sps:$4 sm:$0xff]   ;;  %v2377_v0 = vld [vmem:[#allocation2 + $0x84] ss:$16 sps:$4 sm:$0xff]  }
 0x3f2   :  { %v950_v11 = vpack.c.bf16 %v949_v19, %v949_v19  ;;  %v2380_v19 = vld [vmem:[#allocation2 + $0x8c] ss:$16 sps:$4 sm:$0xff]  }
 0x3f4   :  { %984 = vmatmul.mubr.bf16.vlgmr.msra.gmra.mxu0 %v950_v11  ;;  %1025 = vmatmul.mubr.bf16.vlgmr.msra.gmra.mxu1 %v950_v11  ;;  %v2383_v11 = vld [vmem:[#allocation2 + $0x80] ss:$16 sps:$4 sm:$0xff]  }
 0x3f5   :  { %1054 = vmatpush1.bf16.msra.mxu0 %v1896_v36  ;;  %1095 = vmatpush1.bf16.msra.mxu1 %v1898_v37  ;;  %v2331_v36 = vld [vmem:[#allocation2 + $0xe4] ss:$16 sps:$4 sm:$0xff]   ;;  %v2334_v37 = vld [vmem:[#allocation2 + $0xec] ss:$16 sps:$4 sm:$0xff]  }
 0x3f6   :  { %1055 = vmatprep.subr.bf16.mxu0 %v1905_v39  ;;  %1096 = vmatprep.subr.bf16.mxu1 %v1909_v40 }
 0x3f7   :  { %1085 = vmatprep.mubr.bf16.mxu0 %v2545_v15  ;;  %1126 = vmatprep.mubr.bf16.mxu1 %v2545_v15 }
 0x3f9   :  { %1056 = vmatpush1.bf16.msra.mxu0 %v1913_v41  ;;  %1097 = vmatpush1.bf16.msra.mxu1 %v1915_v42  ;;  %v2549_v41 = vld [vmem:[#allocation8_spill] sm:$0xff] }
 0x3fa   :  { %1057 = vmatprep.subr.bf16.mxu0 %v1926_v44  ;;  %1098 = vmatprep.subr.bf16.mxu1 %v1928_v45 }
 0x3fd   :  { %1058 = vmatpush1.bf16.msra.mxu0 %v1930_v46  ;;  %1099 = vmatpush1.bf16.msra.mxu1 %v1934_v47  ;;  %v2550_v46 = vld [vmem:[#allocation9_spill] sm:$0xff] }
 0x3fe   :  { %1059 = vmatprep.subr.bf16.mxu0 %v1943_v49  ;;  %1100 = vmatprep.subr.bf16.mxu1 %v1945_v50  ;;  %v2551_v49 = vld [vmem:[#allocation10_spill] sm:$0xff] }
 0x401   :  { %1060 = vmatpush1.bf16.msra.mxu0 %v1949_v51  ;;  %1101 = vmatpush1.bf16.msra.mxu1 %v1953_v52 }
 0x402   :  { %1061 = vmatprep.subr.bf16.mxu0 %v1962_v54  ;;  %1102 = vmatprep.subr.bf16.mxu1 %v1966_v55 }
 0x405   :  { %1062 = vmatpush1.bf16.msra.mxu0 %v1970_v56  ;;  %1103 = vmatpush1.bf16.msra.mxu1 %v1972_v57 }
 0x406   :  { %1063 = vmatprep.subr.bf16.mxu0 %v1983_v59  ;;  %1104 = vmatprep.subr.bf16.mxu1 %v1985_v60 }
 0x409   :  { %1064 = vmatpush1.bf16.msra.mxu0 %v1989_v61  ;;  %1105 = vmatpush1.bf16.msra.mxu1 %v1991_v62 }
 0x40a   :  { %1065 = vmatprep.subr.bf16.mxu0 %v2002_v1  ;;  %1106 = vmatprep.subr.bf16.mxu1 %v2004_v2 }
 0x40d   :  { %1066 = vmatpush1.bf16.msra.mxu0 %v2008_v3  ;;  %1107 = vmatpush1.bf16.msra.mxu1 %v2010_v4 }
 0x40e   :  { %1067 = vmatprep.subr.bf16.mxu0 %v2021_v6  ;;  %1108 = vmatprep.subr.bf16.mxu1 %v2023_v7 }
 0x411   :  { %1068 = vmatpush1.bf16.msra.mxu0 %v2027_v8  ;;  %1109 = vmatpush1.bf16.msra.mxu1 %v2029_v9 }
 0x412   :  { %1155 = vmatprep.subr.bf16.mxu0 %v2331_v36  ;;  %1196 = vmatprep.subr.bf16.mxu1 %v2334_v37 }
 0x4b4   :  { %v985_v39 = vpop.f32.mrf.mxu0  ;;  %v1026_v40 = vpop.f32.mrf.mxu1 }
 0x4b5   :  { %v1033_v42 = vadd.f32 %v985_v39, %v2549_v41  ;;  %v1035_v47 = vadd.f32 %v1026_v40, %v2550_v46  ;;  %v2386_v39 = vld [vmem:[#allocation2 + $0x88] ss:$16 sps:$4 sm:$0xff]  }
 0x4b6   :  { %v987_v44 = vpop.f32.mrf.mxu0  ;;  %v1028_v45 = vpop.f32.mrf.mxu1 }
 0x4b7   :  { %1653 = vtanh.f32 %v1033_v42  ;;  %v1034_v50 = vadd.f32 %v987_v44, %v2551_v49  ;;  %v1036_v25 = vadd.f32 %v1028_v45, %v2552_v32 }
 0x4b8   :  { %v989_v51 = vpop.f32.mrf.mxu0  ;;  %v1030_v52 = vpop.f32.mrf.mxu1 }
 0x4b9   :  { %1655 = vtanh.f32 %v1034_v50 }
 0x4ba   :  { %v990_v5 = vpop.f32.mrf.mxu0  ;;  %v1031_v33 = vpop.f32.mrf.mxu1  ;;  %1657 = vtanh.f32 %v1035_v47 }
 0x4bb   :  { %1659 = vtanh.f32 %v1036_v25  ;;  %v1710_v25 = vld [vmem:[#allocation2 + $0x6c] ss:$16 sps:$4 sm:$0xff]  }
 0x4c4   :  { %v1654_v18 = vpop.eup %1653 }
 0x4c5   :  { %v1041_v31 = vmul.f32 0.5, %v1654_v18  ;;  %v1711_v18 = vld [vmem:[#allocation2 + $0x60] ss:$16 sps:$4 sm:$0xff]  }
 0x4c6   :  { %v1656_v43 = vpop.eup %1655 }
 0x4c7   :  { %v1042_v16 = vadd.f32 0.5, %v1041_v31  ;;  %v1043_v22 = vmul.f32 0.5, %v1656_v43  ;;  %v1658_v20 = vpop.eup %1657  ;;  %v1712_v31 = vld [vmem:[#allocation2 + $0x68] ss:$16 sps:$4 sm:$0xff]   ;;  %v1713_v43 = vld [vmem:[#allocation2 + $0x44] ss:$16 sps:$4 sm:$0xff]  }
 0x4c8   :  { %v1660_v23 = vpop.eup %1659 }
 0x4c9   :  { %v1044_v10 = vadd.f32 0.5, %v1043_v22  ;;  %v1048_v26 = vmul.f32 %v1658_v20, %v1042_v16  ;;  %v1045_v34 = vmul.f32 0.5, %v1660_v23  ;;  %v1714_v16 = vld [vmem:[#allocation2 + $0x4c] ss:$16 sps:$4 sm:$0xff]   ;;  %v1715_v22 = vld [vmem:[#allocation2 + $0x40] ss:$16 sps:$4 sm:$0xff]  }
 0x4ca   :  { %v1716_v20 = vld [vmem:[#allocation2 + $0x48] ss:$16 sps:$4 sm:$0xff]   ;;  %v1721_v23 = vld [vmem:[#allocation2 + $0x4] ss:$16 sps:$4 sm:$0xff]  }
 0x4cb   :  { %v1047_v13 = vmul.f32 %v1044_v10, %v2296_v29  ;;  %v1046_v24 = vadd.f32 0.5, %v1045_v34  ;;  %v2365_v29 = vld [vmem:[#allocation2 + $0xa4] ss:$16 sps:$4 sm:$0xff]   ;;  %v1722_v34 = vld [vmem:[#allocation2 + $0xc] ss:$16 sps:$4 sm:$0xff]  }
 0x4cc   :  { %v1717_v10 = vld [vmem:[#allocation2 + $0x24] ss:$16 sps:$4 sm:$0xff]  }
 0x4cd   :  { %v2342_v17 = vadd.f32 %v1048_v26, %v1047_v13  ;;  %v1718_v26 = vld [vmem:[#allocation2 + $0x2c] ss:$16 sps:$4 sm:$0xff]   ;;  %v1719_v13 = vld [vmem:[#allocation2 + $0x20] ss:$16 sps:$4 sm:$0xff]  }
 0x4cf   :  { %1661 = vtanh.f32 %v2342_v17 }
 0x4dc   :  { %v1662_v35 = vpop.eup %1661 }
 0x4dd   :  { %v1051_v38 = vmul.f32 %v1662_v35, %v1046_v24  ;;  %v1723_v24 = vld [vmem:[#allocation2] ss:$16 sps:$4 sm:$0xff]   ;;  %v1724_v35 = vld [vmem:[#allocation2 + $0x8] ss:$16 sps:$4 sm:$0xff]  }
 0x4df   :  { %v1052_v63 = vpack.c.bf16 %v1051_v38, %v1051_v38  ;;  %v2557_v38 = vmov 0.0  }
 0x4e1   :  { %1086 = vmatmul.mubr.bf16.vlgmr.msra.gmra.mxu0 %v1052_v63  ;;  %1127 = vmatmul.mubr.bf16.vlgmr.msra.gmra.mxu1 %v1052_v63 }
 0x4e2   :  { %1156 = vmatpush1.bf16.msra.mxu0 %v2345_v28  ;;  %1197 = vmatpush1.bf16.msra.mxu1 %v2348_v14 }
 0x4e3   :  { %1157 = vmatprep.subr.bf16.mxu0 %v2351_v12  ;;  %1198 = vmatprep.subr.bf16.mxu1 %v2354_v48 }
 0x4e4   :  { %1187 = vmatprep.mubr.bf16.mxu0 %v2545_v15  ;;  %1228 = vmatprep.mubr.bf16.mxu1 %v2545_v15 }
 0x4e6   :  { %1158 = vmatpush1.bf16.msra.mxu0 %v2359_v30  ;;  %1199 = vmatpush1.bf16.msra.mxu1 %v2362_v58 }
 0x4e7   :  { %1159 = vmatprep.subr.bf16.mxu0 %v2365_v29  ;;  %1200 = vmatprep.subr.bf16.mxu1 %v2368_v53 }
 0x4ea   :  { %1160 = vmatpush1.bf16.msra.mxu0 %v2371_v21  ;;  %1201 = vmatpush1.bf16.msra.mxu1 %v2374_v27 }
 0x4eb   :  { %1161 = vmatprep.subr.bf16.mxu0 %v2377_v0  ;;  %1202 = vmatprep.subr.bf16.mxu1 %v2380_v19 }
 0x4ee   :  { %1162 = vmatpush1.bf16.msra.mxu0 %v2383_v11  ;;  %1203 = vmatpush1.bf16.msra.mxu1 %v2386_v39 }
 0x4ef   :  { %1163 = vmatprep.subr.bf16.mxu0 %v1962_v54  ;;  %1204 = vmatprep.subr.bf16.mxu1 %v1966_v55 }
 0x4f2   :  { %1164 = vmatpush1.bf16.msra.mxu0 %v1970_v56  ;;  %1205 = vmatpush1.bf16.msra.mxu1 %v1972_v57  ;;  %v2553_v56 = vld [vmem:[#allocation12_spill] sm:$0xff] }
 0x4f3   :  { %1165 = vmatprep.subr.bf16.mxu0 %v1983_v59  ;;  %1206 = vmatprep.subr.bf16.mxu1 %v1985_v60 }
 0x4f6   :  { %1166 = vmatpush1.bf16.msra.mxu0 %v1989_v61  ;;  %1207 = vmatpush1.bf16.msra.mxu1 %v1991_v62  ;;  %v2554_v61 = vld [vmem:[#allocation13_spill] sm:$0xff] }
 0x4f7   :  { %1167 = vmatprep.subr.bf16.mxu0 %v2002_v1  ;;  %1208 = vmatprep.subr.bf16.mxu1 %v2004_v2  ;;  %v2555_v1 = vld [vmem:[#allocation14_spill] sm:$0xff] }
 0x4fa   :  { %1168 = vmatpush1.bf16.msra.mxu0 %v2008_v3  ;;  %1209 = vmatpush1.bf16.msra.mxu1 %v2010_v4 }
 0x4fb   :  { %1169 = vmatprep.subr.bf16.mxu0 %v2021_v6  ;;  %1210 = vmatprep.subr.bf16.mxu1 %v2023_v7 }
 0x4fe   :  { %1170 = vmatpush1.bf16.msra.mxu0 %v2027_v8  ;;  %1211 = vmatpush1.bf16.msra.mxu1 %v2029_v9  ;;  %v2556_v8 = vld [vmem:[#allocation15_spill] sm:$0xff] }
 0x4ff   :  { %1257 = vmatprep.subr.bf16.mxu0 %v2331_v36  ;;  %1298 = vmatprep.subr.bf16.mxu1 %v2334_v37 }
 0x5a1   :  { %v1087_v54 = vpop.f32.mrf.mxu0  ;;  %v1128_v55 = vpop.f32.mrf.mxu1 }
 0x5a2   :  { %v1135_v57 = vadd.f32 %v1087_v54, %v2553_v56  ;;  %v1137_v62 = vadd.f32 %v1128_v55, %v2554_v61 }
 0x5a3   :  { %v1089_v59 = vpop.f32.mrf.mxu0  ;;  %v1130_v60 = vpop.f32.mrf.mxu1 }
 0x5a4   :  { %1663 = vtanh.f32 %v1135_v57  ;;  %v1136_v2 = vadd.f32 %v1089_v59, %v2555_v1  ;;  %v1138_v9 = vadd.f32 %v1130_v60, %v2556_v8 }
 0x5a5   :  { %v1091_v3 = vpop.f32.mrf.mxu0  ;;  %v1132_v4 = vpop.f32.mrf.mxu1 }
 0x5a6   :  { %1665 = vtanh.f32 %v1136_v2 }
 0x5a7   :  { %v1092_v6 = vpop.f32.mrf.mxu0  ;;  %v1133_v7 = vpop.f32.mrf.mxu1  ;;  %1667 = vtanh.f32 %v1137_v62 }
 0x5a8   :  { %1669 = vtanh.f32 %v1138_v9 }
 0x5b1   :  { %v1664_v36 = vpop.eup %1663 }
 0x5b2   :  { %v1143_v37 = vmul.f32 0.5, %v1664_v36 }
 0x5b3   :  { %v1666_v40 = vpop.eup %1665 }
 0x5b4   :  { %v1144_v41 = vadd.f32 0.5, %v1143_v37  ;;  %v1145_v42 = vmul.f32 0.5, %v1666_v40  ;;  %v1668_v44 = vpop.eup %1667  ;;  %v1373_v37 = vld [vmem:[%s2519_s4 + $0x78] sm:$0xff]  ;;  %v1372_v40 = vld [vmem:[%s2519_s4 + $0x70] sm:$0xff] }
 0x5b5   :  { %v1670_v50 = vpop.eup %1669 }
 0x5b6   :  { %v1146_v45 = vadd.f32 0.5, %v1145_v42  ;;  %v1150_v46 = vmul.f32 %v1668_v44, %v1144_v41  ;;  %v1147_v51 = vmul.f32 0.5, %v1670_v50  ;;  %v1371_v41 = vld [vmem:[%s2519_s4 + $0x68] sm:$0xff]  ;;  %v1370_v42 = vld [vmem:[%s2519_s4 + $0x60] sm:$0xff]  ;;  %v1369_v44 = vld [vmem:[%s2519_s4 + $0x58] sm:$0xff] }
 0x5b7   :  { %v1364_v50 = vld [vmem:[%s2519_s4 + $0x30] sm:$0xff] }
 0x5b8   :  { %v1149_v47 = vmul.f32 %v1146_v45, %v2342_v17  ;;  %v1148_v52 = vadd.f32 0.5, %v1147_v51  ;;  %v1720_v17 = vld [vmem:[#allocation2 + $0x28] ss:$16 sps:$4 sm:$0xff]   ;;  %v1368_v45 = vld [vmem:[%s2519_s4 + $0x50] sm:$0xff] }
 0x5b9   :  { %v1363_v51 = vld [vmem:[%s2519_s4 + $0x28] sm:$0xff] }
 0x5ba   :  { %v2412_v49 = vadd.f32 %v1150_v46, %v1149_v47  ;;  %v1367_v46 = vld [vmem:[%s2519_s4 + $0x48] sm:$0xff]  ;;  %v1366_v47 = vld [vmem:[%s2519_s4 + $0x40] sm:$0xff] }
 0x5bc   :  { %1671 = vtanh.f32 %v2412_v49 }
 0x5c9   :  { %v1672_v5 = vpop.eup %1671 }
 0x5ca   :  { %v1153_v33 = vmul.f32 %v1672_v5, %v1148_v52  ;;  %v1362_v52 = vld [vmem:[%s2519_s4 + $0x20] sm:$0xff]  ;;  %v1361_v5 = vld [vmem:[%s2519_s4 + $0x18] sm:$0xff] }
 0x5cc   :  { %v1154_v32 = vpack.c.bf16 %v1153_v33, %v1153_v33  ;;  %v1360_v33 = vld [vmem:[%s2519_s4 + $0x10] sm:$0xff] }
 0x5ce   :  { %1188 = vmatmul.mubr.bf16.vlgmr.msra.gmra.mxu0 %v1154_v32  ;;  %1229 = vmatmul.mubr.bf16.vlgmr.msra.gmra.mxu1 %v1154_v32  ;;  %v1359_v32 = vld [vmem:[%s2519_s4 + $0x8] sm:$0xff] }
 0x5cf   :  { %1258 = vmatpush1.bf16.msra.mxu0 %v2345_v28  ;;  %1299 = vmatpush1.bf16.msra.mxu1 %v2348_v14  ;;  %v2558_v14 = vld [vmem:[#allocation16_spill] sm:$0xff] }
 0x5d0   :  { %1259 = vmatprep.subr.bf16.mxu0 %v2351_v12  ;;  %1300 = vmatprep.subr.bf16.mxu1 %v2354_v48 }
 0x5d1   :  { %1289 = vmatprep.mubr.bf16.mxu0 %v2545_v15  ;;  %1330 = vmatprep.mubr.bf16.mxu1 %v2545_v15  ;;  %v1709_v15 = vld [vmem:[#allocation2 + $0x64] ss:$16 sps:$4 sm:$0xff]  }
 0x5d3   :  { %1260 = vmatpush1.bf16.msra.mxu0 %v2359_v30  ;;  %1301 = vmatpush1.bf16.msra.mxu1 %v2362_v58  ;;  %v2559_v58 = vld [vmem:[#allocation17_spill] sm:$0xff] }
 0x5d4   :  { %1261 = vmatprep.subr.bf16.mxu0 %v2365_v29  ;;  %1302 = vmatprep.subr.bf16.mxu1 %v2368_v53  ;;  %v2560_v53 = vld [vmem:[#allocation18_spill] sm:$0xff] }
 0x5d7   :  { %1262 = vmatpush1.bf16.msra.mxu0 %v2371_v21  ;;  %1303 = vmatpush1.bf16.msra.mxu1 %v2374_v27 }
 0x5d8   :  { %1263 = vmatprep.subr.bf16.mxu0 %v2377_v0  ;;  %1304 = vmatprep.subr.bf16.mxu1 %v2380_v19 }
 0x5db   :  { %1264 = vmatpush1.bf16.msra.mxu0 %v2383_v11  ;;  %1305 = vmatpush1.bf16.msra.mxu1 %v2386_v39  ;;  %v2561_v39 = vld [vmem:[#allocation19_spill] sm:$0xff] }
 0x5dc   :  { %1265 = vmatprep.subr.bf16.mxu0 %v1709_v15  ;;  %1306 = vmatprep.subr.bf16.mxu1 %v1710_v25  ;;  %v1358_v15 = vld [vmem:[%s2519_s4] sm:$0xff] }
 0x5df   :  { %1266 = vmatpush1.bf16.msra.mxu0 %v1711_v18  ;;  %1307 = vmatpush1.bf16.msra.mxu1 %v1712_v31  ;;  %v2562_v31 = vld [vmem:[#allocation20_spill] sm:$0xff] }
 0x5e0   :  { %1267 = vmatprep.subr.bf16.mxu0 %v1713_v43  ;;  %1308 = vmatprep.subr.bf16.mxu1 %v1714_v16 }
 0x5e3   :  { %1268 = vmatpush1.bf16.msra.mxu0 %v1715_v22  ;;  %1309 = vmatpush1.bf16.msra.mxu1 %v1716_v20  ;;  %v2563_v20 = vld [vmem:[#allocation21_spill] sm:$0xff] }
 0x5e4   :  { %1269 = vmatprep.subr.bf16.mxu0 %v1717_v10  ;;  %1310 = vmatprep.subr.bf16.mxu1 %v1718_v26  ;;  %v2564_v26 = vld [vmem:[#allocation22_spill] sm:$0xff] }
 0x5e7   :  { %1270 = vmatpush1.bf16.msra.mxu0 %v1719_v13  ;;  %1311 = vmatpush1.bf16.msra.mxu1 %v1720_v17 }
 0x5e8   :  { %1271 = vmatprep.subr.bf16.mxu0 %v1721_v23  ;;  %1312 = vmatprep.subr.bf16.mxu1 %v1722_v34 }
 0x5eb   :  { %1272 = vmatpush1.bf16.msra.mxu0 %v1723_v24  ;;  %1313 = vmatpush1.bf16.msra.mxu1 %v1724_v35  ;;  %v2565_v35 = vld [vmem:[#allocation23_spill] sm:$0xff] }
 0x5ec   :  { %1524 = vmatprep.subr.mxu0 %v2557_v38 }
 0x68e   :  { %v1189_v63 = vpop.f32.mrf.mxu0  ;;  %v1230_v28 = vpop.f32.mrf.mxu1 }
 0x68f   :  { %v1237_v12 = vadd.f32 %v1189_v63, %v2558_v14  ;;  %v1239_v29 = vadd.f32 %v1230_v28, %v2559_v58 }
 0x690   :  { %v1191_v48 = vpop.f32.mrf.mxu0  ;;  %v1232_v30 = vpop.f32.mrf.mxu1 }
 0x691   :  { %1673 = vtanh.f32 %v1237_v12  ;;  %v1238_v21 = vadd.f32 %v1191_v48, %v2560_v53  ;;  %v1240_v54 = vadd.f32 %v1232_v30, %v2561_v39 }
 0x692   :  { %v1193_v27 = vpop.f32.mrf.mxu0  ;;  %v1234_v0 = vpop.f32.mrf.mxu1 }
 0x693   :  { %1675 = vtanh.f32 %v1238_v21 }
 0x694   :  { %v1194_v19 = vpop.f32.mrf.mxu0  ;;  %v1235_v11 = vpop.f32.mrf.mxu1  ;;  %1677 = vtanh.f32 %v1239_v29 }
 0x695   :  { %1679 = vtanh.f32 %v1240_v54  ;;  %v1506_v54 = vld [vmem:[%s2520_s5] ss:$0 sm:$0xff] }
 0x69e   :  { %v1674_v55 = vpop.eup %1673 }
 0x69f   :  { %v1245_v56 = vmul.f32 0.5, %v1674_v55 }
 0x6a0   :  { %v1676_v57 = vpop.eup %1675 }
 0x6a1   :  { %v1246_v59 = vadd.f32 0.5, %v1245_v56  ;;  %v1247_v60 = vmul.f32 0.5, %v1676_v57  ;;  %v1678_v61 = vpop.eup %1677 }
 0x6a2   :  { %v1680_v4 = vpop.eup %1679 }
 0x6a3   :  { %v1248_v62 = vadd.f32 0.5, %v1247_v60  ;;  %v1252_v1 = vmul.f32 %v1678_v61, %v1246_v59  ;;  %v1249_v6 = vmul.f32 0.5, %v1680_v4 }
 0x6a5   :  { %v1251_v2 = vmul.f32 %v1248_v62, %v2412_v49  ;;  %v1250_v7 = vadd.f32 0.5, %v1249_v6  ;;  %v1365_v49 = vld [vmem:[%s2519_s4 + $0x38] sm:$0xff] }
 0x6a7   :  { %v2437_v3 = vadd.f32 %v1252_v1, %v1251_v2 }
 0x6a9   :  { %1681 = vtanh.f32 %v2437_v3 }
 0x6b6   :  { %v1682_v8 = vpop.eup %1681 }
 0x6b7   :  { %v1255_v9 = vmul.f32 %v1682_v8, %v1250_v7 }
 0x6b9   :  { %v1256_v36 = vpack.c.bf16 %v1255_v9, %v1255_v9 }
 0x6bb   :  { %1290 = vmatmul.mubr.bf16.vlgmr.msra.gmra.mxu0 %v1256_v36  ;;  %1331 = vmatmul.mubr.bf16.vlgmr.msra.gmra.mxu1 %v1256_v36 }
 0x6bc   :  { %1525 = vmatpush3.msra.mxu0 %v1373_v37  ;;  %1556 = vmatprep.mubr.msk.f32.mxu0 %vm1752_vm1, %v2557_v38 }
 0x6bd   :  { %1526 = vmatprep.subr.mxu0 %v2557_v38 }
 0x6be   :  { %1527 = vmatpush3.msra.mxu0 %v1372_v40 }
 0x6bf   :  { %1528 = vmatprep.subr.mxu0 %v2557_v38 }
 0x6c0   :  { %1529 = vmatpush3.msra.mxu0 %v1371_v41 }
 0x6c1   :  { %1530 = vmatprep.subr.mxu0 %v2557_v38 }
 0x6c2   :  { %1531 = vmatpush3.msra.mxu0 %v1370_v42 }
 0x6c3   :  { %1532 = vmatprep.subr.mxu0 %v2557_v38 }
 0x6c4   :  { %1533 = vmatpush3.msra.mxu0 %v1369_v44 }
 0x6c5   :  { %1534 = vmatprep.subr.mxu0 %v2557_v38 }
 0x6c6   :  { %1535 = vmatpush3.msra.mxu0 %v1368_v45 }
 0x6c7   :  { %1536 = vmatprep.subr.mxu0 %v2557_v38 }
 0x6c8   :  { %1537 = vmatpush3.msra.mxu0 %v1367_v46 }
 0x6c9   :  { %1538 = vmatprep.subr.mxu0 %v2557_v38 }
 0x6ca   :  { %1539 = vmatpush3.msra.mxu0 %v1366_v47 }
 0x6cb   :  { %1540 = vmatprep.subr.mxu0 %v2557_v38 }
 0x6cc   :  { %1541 = vmatpush3.msra.mxu0 %v1365_v49 }
 0x6cd   :  { %1542 = vmatprep.subr.mxu0 %v2557_v38 }
 0x6ce   :  { %1543 = vmatpush3.msra.mxu0 %v1364_v50 }
 0x6cf   :  { %1544 = vmatprep.subr.mxu0 %v2557_v38 }
 0x6d0   :  { %1545 = vmatpush3.msra.mxu0 %v1363_v51 }
 0x6d1   :  { %1546 = vmatprep.subr.mxu0 %v2557_v38 }
 0x6d2   :  { %1547 = vmatpush3.msra.mxu0 %v1362_v52 }
 0x6d3   :  { %1548 = vmatprep.subr.mxu0 %v2557_v38 }
 0x6d4   :  { %1549 = vmatpush3.msra.mxu0 %v1361_v5 }
 0x6d5   :  { %1550 = vmatprep.subr.mxu0 %v2557_v38 }
 0x6d6   :  { %1551 = vmatpush3.msra.mxu0 %v1360_v33 }
 0x6d7   :  { %1552 = vmatprep.subr.mxu0 %v2557_v38 }
 0x6d8   :  { %1553 = vmatpush3.msra.mxu0 %v1359_v32 }
 0x6d9   :  { %1554 = vmatprep.subr.mxu0 %v2557_v38 }
 0x6da   :  { %1555 = vmatpush3.msra.mxu0 %v1358_v15 }
 0x77b   :  { %v1291_v25 = vpop.f32.mrf.mxu0  ;;  %v1332_v18 = vpop.f32.mrf.mxu1 }
 0x77c   :  { %v1339_v43 = vadd.f32 %v1291_v25, %v2562_v31  ;;  %v1341_v10 = vadd.f32 %v1332_v18, %v2563_v20 }
 0x77d   :  { %v1293_v16 = vpop.f32.mrf.mxu0  ;;  %v1334_v22 = vpop.f32.mrf.mxu1 }
 0x77e   :  { %1683 = vtanh.f32 %v1339_v43  ;;  %v1340_v13 = vadd.f32 %v1293_v16, %v2564_v26  ;;  %v1342_v38 = vadd.f32 %v1334_v22, %v2565_v35 }
 0x77f   :  { %v1295_v17 = vpop.f32.mrf.mxu0  ;;  %v1336_v23 = vpop.f32.mrf.mxu1 }
 0x780   :  { %1685 = vtanh.f32 %v1340_v13 }
 0x781   :  { %v1296_v34 = vpop.f32.mrf.mxu0  ;;  %v1337_v24 = vpop.f32.mrf.mxu1  ;;  %1687 = vtanh.f32 %v1341_v10 }
 0x782   :  { %1689 = vtanh.f32 %v1342_v38 }
 0x78b   :  { %v1684_v63 = vpop.eup %1683 }
 0x78c   :  { %v1347_v28 = vmul.f32 0.5, %v1684_v63 }
 0x78d   :  { %v1686_v14 = vpop.eup %1685 }
 0x78e   :  { %v1348_v12 = vadd.f32 0.5, %v1347_v28  ;;  %v1349_v48 = vmul.f32 0.5, %v1686_v14  ;;  %v1688_v30 = vpop.eup %1687 }
 0x78f   :  { %v1690_v27 = vpop.eup %1689 }
 0x790   :  { %v1350_v58 = vadd.f32 0.5, %v1349_v48  ;;  %v1354_v29 = vmul.f32 %v1688_v30, %v1348_v12  ;;  %v1351_v0 = vmul.f32 0.5, %v1690_v27 }
 0x792   :  { %v1353_v53 = vmul.f32 %v1350_v58, %v2437_v3  ;;  %v1352_v19 = vadd.f32 0.5, %v1351_v0 }
 0x794   :  { %v1355_v21 = vadd.f32 %v1354_v29, %v1353_v53 }
 0x796   :  { %1691 = vtanh.f32 %v1355_v21 }
 0x7a3   :  { %v1692_v11 = vpop.eup %1691 }
 0x7a4   :  { %v1357_v39 = vmul.f32 %v1692_v11, %v1352_v19 }
 0x7a6   :  { %1557 = vmatmul.mubr.f32.vlgmr.msra.gmra.mxu0 %v1357_v39 }
 0x866   :  { %v1447_v55 = vpop.f32.mrf.mxu0 }
 0x867   :  { %v1448_v56 = vadd.f32 %v1506_v54, %v1447_v55 }
 0x868   :  { %v1558_v57 = vpop.f32.mrf.mxu0 }
 0x869   :  { %1452 = vst.msk [vmem:[%s2521_s6] sm:$0xff] %vm1451_vm2, %v1448_v56 }
 0x86a   :  { %1457 = vsyncpa [#allocation3], 1 }

</bundles_post_ra>
